<compile_context>
chip_gen: v7x
topology: tpu7x:2x2x1
jax: 0.10.0
libtpu: 0.0.40
codegen_flags: <defaults>
</compile_context>

<pallas_src>
from functools import partial

import jax
import jax.numpy as jnp
from jax import lax
from jax.experimental import pallas as pl
from jax.experimental.pallas import tpu as pltpu


NEG_BIG = -1e30  # plain Python float (NOT a jnp array -> no captured constant)


def _spec(shape):
    n = len(shape)
    return pl.BlockSpec(shape, lambda i, n=n: (0,) * n)


def _mx(a, b):
    # bf16-input MXU matmul with f32 accumulation (lossless for 0/1 operands).
    return jnp.dot(a.astype(jnp.bfloat16), b.astype(jnp.bfloat16),
                   preferred_element_type=jnp.float32)


# --------------------------------------------------------------------- kernel
def gpoolnet_kernel(
        a_ref, x_ref, same_ref, gn_ref, ng_ref,
        c1r_ref, c1e_ref, c1b_ref,
        c2r_ref, c2e_ref, c2b_ref,
        c3r_ref, c3e_ref, c3b_ref,
        p1_ref, p2_ref, p3_ref,
        l1wm_ref, l1we_ref, l1b_ref,
        l2w_ref, l2b_ref, l3w_ref, l3b_ref,
        o_ref, *, ratio):
    f32 = jnp.float32
    N = a_ref.shape[0]
    G = gn_ref.shape[0]
    H = c1r_ref.shape[1]

    A = a_ref[...]            # [N, N] dense adjacency (A[dst, src] = 1)
    same = same_ref[...]      # [N, N] 1.0 iff nodes belong to the same graph
    GN = gn_ref[...]          # [G, N] graph-by-node one-hot membership
    NG = ng_ref[...]          # [N, G] node-by-graph one-hot membership

    eye = (lax.broadcasted_iota(jnp.int32, (N, N), 0)
           == lax.broadcasted_iota(jnp.int32, (N, N), 1)).astype(f32)
    ones_nn = jnp.ones((N, N), f32)
    idx_i = lax.broadcasted_iota(jnp.int32, (N, N), 0)     # row (destination) id
    idx_j = lax.broadcasted_iota(jnp.int32, (N, N), 1)     # col (candidate) id
    g_iota = lax.broadcasted_iota(jnp.int32, (G, 1), 0)    # [G, 1]

    def row_broadcast(col):
        # [N,1] column -> [N,N] with result[i, j] = col[j]; MXU diag trick,
        # avoids any in-kernel transpose / sublane<->lane relayout. Exact:
        # each output element is a single 1.0 * col[j] product.
        return jnp.dot(ones_nn, col * eye, preferred_element_type=f32)

    def graph_conv_relu(h, w_root, w_rel, b):
        agg = _mx(A, h)                                    # sum over in-neighbours
        return jnp.maximum(_mx(h, w_root) + _mx(agg, w_rel) + b, 0.0)

    def topk_pool(h, p_row, active_col):
        # projection score (p pre-normalized in the wrapper)
        raw = jnp.sum(h * p_row, axis=-1, keepdims=True)             # [N, 1]
        score = jnp.where(active_col > 0.5, raw, NEG_BIG)
        s_nn = row_broadcast(score)                                   # s_nn[i,j] = score[j]
        better = ((s_nn > score)
                  | ((s_nn == score) & (idx_j < idx_i))).astype(f32)
        rank = jnp.sum(same * better, axis=-1, keepdims=True)         # rank within own graph
        counts = jnp.dot(same, active_col,
                         preferred_element_type=f32)                  # active nodes per graph
        # rank < ratio*counts  <=>  rank < ceil(ratio*counts) for integer rank
        keep_col = active_col * (rank < ratio * counts).astype(f32)   # [N, 1]
        h = h * (jnp.tanh(raw) * keep_col)                            # TopK feature gate
        return h, keep_col

    def readout(h, keep_col, acc_max, acc_mean):
        cnt = jnp.dot(GN, keep_col, preferred_element_type=f32)       # [G, 1] kept nodes/graph
        acc_mean = acc_mean + _mx(GN, h) / jnp.maximum(cnt, 1.0)      # mean pool on the MXU
        for g in range(G):                                            # G small & static
            mem = NG[:, g:g + 1] * keep_col                           # [N, 1] membership col
            mx = jnp.max(jnp.where(mem > 0.5, h, NEG_BIG),
                         axis=0, keepdims=True)                       # [1, H]
            mx = jnp.where(cnt[g:g + 1, :] > 0.5, mx, 0.0)            # guard empty graph
            acc_max = acc_max + (g_iota == g).astype(f32) * mx        # place row g
        return acc_max, acc_mean

    active_col = jnp.ones((N, 1), f32)
    acc_max = jnp.zeros((G, H), f32)
    acc_mean = jnp.zeros((G, H), f32)

    h = graph_conv_relu(x_ref[...], c1r_ref[...], c1e_ref[...], c1b_ref[...])
    h, active_col = topk_pool(h, p1_ref[...], active_col)
    acc_max, acc_mean = readout(h, active_col, acc_max, acc_mean)

    h = graph_conv_relu(h, c2r_ref[...], c2e_ref[...], c2b_ref[...])
    h, active_col = topk_pool(h, p2_ref[...], active_col)
    acc_max, acc_mean = readout(h, active_col, acc_max, acc_mean)

    h = graph_conv_relu(h, c3r_ref[...], c3e_ref[...], c3b_ref[...])
    h, active_col = topk_pool(h, p3_ref[...], active_col)
    acc_max, acc_mean = readout(h, active_col, acc_max, acc_mean)

    # MLP head: concat([max, mean]) @ W1 == max @ W1[:H] + mean @ W1[H:]
    h1 = jnp.maximum(_mx(acc_max, l1wm_ref[...]) + _mx(acc_mean, l1we_ref[...])
                     + l1b_ref[...], 0.0)
    # TODO(synk): F.dropout(p=0.5) is identity in eval mode; training-mode dropout not implemented.
    h2 = jnp.maximum(_mx(h1, l2w_ref[...]) + l2b_ref[...], 0.0)
    logits = _mx(h2, l3w_ref[...]) + l3b_ref[...]
    z = logits - jnp.max(logits, axis=-1, keepdims=True)
    o_ref[...] = z - jnp.log(jnp.sum(jnp.exp(z), axis=-1, keepdims=True))


# ------------------------------------------------------------------- wrapper
@partial(jax.jit, static_argnames=("num_graphs", "ratio"))
def gpoolnet_forward(x, A, batch, params, *, num_graphs, ratio):
    G = num_graphs
    H = params["c1_wroot"].shape[1]
    C = params["l3_w"].shape[1]

    # static graph-structure helpers (batch-dependent only; tiny, built by XLA)
    same = (batch[:, None] == batch[None, :]).astype(jnp.float32)     # [N, N]
    ng = jax.nn.one_hot(batch, G, dtype=jnp.float32)                  # [N, G]
    gn = ng.T                                                         # [G, N]

    def p_row(p):  # pre-normalised projection vector, zero-norm guarded
        return (p / jnp.maximum(jnp.linalg.norm(p), 1e-12)).reshape(1, -1)

    l1w_max, l1w_mean = params["l1_w"][:H, :], params["l1_w"][H:, :]

    args = (A, x, same, gn, ng,
            params["c1_wroot"], params["c1_wrel"], params["c1_b"],
            params["c2_wroot"], params["c2_wrel"], params["c2_b"],
            params["c3_wroot"], params["c3_wrel"], params["c3_b"],
            p_row(params["p1"]), p_row(params["p2"]), p_row(params["p3"]),
            l1w_max, l1w_mean, params["l1_b"],
            params["l2_w"], params["l2_b"], params["l3_w"], params["l3_b"])

    return pl.pallas_call(
        partial(gpoolnet_kernel, ratio=float(ratio)),
        out_shape=jax.ShapeDtypeStruct((G, C), jnp.float32),
        grid=(1,),
        in_specs=[_spec(a.shape) for a in args],
        out_specs=_spec((G, C)),
        compiler_params=pltpu.CompilerParams(
            dimension_semantics=("arbitrary",)),
    )(*args)


# ---------------------------------------------------------------------- main
if __name__ == "__main__":
    N, F_IN, HIDDEN, NUM_CLASSES, NUM_GRAPHS, RATIO = 16, 4, 32, 4, 2, 0.8

    key = jax.random.PRNGKey(0)
    keys = jax.random.split(key, 16)

    # --- deterministic inputs: 2 graphs of 8 nodes each, bidirectional rings
    batch = jnp.array([0] * 8 + [1] * 8, dtype=jnp.int32)
    x = jax.random.normal(keys[0], (N, F_IN), dtype=jnp.float32)
    src, dst = [], []
    for g in range(NUM_GRAPHS):
        base = g * 8
        for i in range(8):
            a, b = base + i, base + (i + 1) % 8
            src += [a, b]
            dst += [b, a]
    edge_index = jnp.array([src, dst], dtype=jnp.int32)     # [2, E]
    A = jnp.zeros((N, N), jnp.float32).at[edge_index[1], edge_index[0]].add(1.0)

    # --- deterministic parameters
    def init_linear(k, fan_in, fan_out):
        kw, kb = jax.random.split(k)
        w = jax.random.normal(kw, (fan_in, fan_out), jnp.float32) / jnp.sqrt(float(fan_in))
        b = 0.01 * jax.random.normal(kb, (1, fan_out), jnp.float32)
        return w, b

    def init_graphconv(k, fan_in, fan_out):
        k1, k2 = jax.random.split(k)
        w_rel, b = init_linear(k1, fan_in, fan_out)
        w_root, _ = init_linear(k2, fan_in, fan_out)
        return w_root, w_rel, b

    c1_wroot, c1_wrel, c1_b = init_graphconv(keys[1], F_IN, HIDDEN)
    c2_wroot, c2_wrel, c2_b = init_graphconv(keys[2], HIDDEN, HIDDEN)
    c3_wroot, c3_wrel, c3_b = init_graphconv(keys[3], HIDDEN, HIDDEN)
    p1 = jax.random.normal(keys[4], (HIDDEN,), jnp.float32)
    p2 = jax.random.normal(keys[5], (HIDDEN,), jnp.float32)
    p3 = jax.random.normal(keys[6], (HIDDEN,), jnp.float32)
    l1_w, l1_b = init_linear(keys[7], HIDDEN * 2, HIDDEN)
    l2_w, l2_b = init_linear(keys[8], HIDDEN, HIDDEN // 2)
    l3_w, l3_b = init_linear(keys[9], HIDDEN // 2, NUM_CLASSES)

    params = dict(
        c1_wroot=c1_wroot, c1_wrel=c1_wrel, c1_b=c1_b,
        c2_wroot=c2_wroot, c2_wrel=c2_wrel, c2_b=c2_b,
        c3_wroot=c3_wroot, c3_wrel=c3_wrel, c3_b=c3_b,
        p1=p1, p2=p2, p3=p3,
        l1_w=l1_w, l1_b=l1_b, l2_w=l2_w, l2_b=l2_b, l3_w=l3_w, l3_b=l3_b,
    )

    out = gpoolnet_forward(x, A, batch, params,
                           num_graphs=NUM_GRAPHS, ratio=RATIO)
    out = jax.block_until_ready(out)
    assert out.shape == (NUM_GRAPHS, NUM_CLASSES)
    assert bool(jnp.all(jnp.isfinite(out)))
    # log_softmax rows should sum (in prob space) to ~1
    assert bool(jnp.allclose(jnp.sum(jnp.exp(out), axis=-1), 1.0, atol=1e-4))
    print("KERNEL_OK")
</pallas_src>

<mosaic_0001>
module attributes {stable_mosaic.version = 11 : i64} {
  func.func @gpoolnet_kernel(%arg0: i32, %arg1: memref<16x16xf32, #tpu.memory_space<vmem>>, %arg2: memref<16x4xf32, #tpu.memory_space<vmem>>, %arg3: memref<16x16xf32, #tpu.memory_space<vmem>>, %arg4: memref<2x16xf32, #tpu.memory_space<vmem>>, %arg5: memref<16x2xf32, #tpu.memory_space<vmem>>, %arg6: memref<4x32xf32, #tpu.memory_space<vmem>>, %arg7: memref<4x32xf32, #tpu.memory_space<vmem>>, %arg8: memref<1x32xf32, #tpu.memory_space<vmem>>, %arg9: memref<32x32xf32, #tpu.memory_space<vmem>>, %arg10: memref<32x32xf32, #tpu.memory_space<vmem>>, %arg11: memref<1x32xf32, #tpu.memory_space<vmem>>, %arg12: memref<32x32xf32, #tpu.memory_space<vmem>>, %arg13: memref<32x32xf32, #tpu.memory_space<vmem>>, %arg14: memref<1x32xf32, #tpu.memory_space<vmem>>, %arg15: memref<1x32xf32, #tpu.memory_space<vmem>>, %arg16: memref<1x32xf32, #tpu.memory_space<vmem>>, %arg17: memref<1x32xf32, #tpu.memory_space<vmem>>, %arg18: memref<32x32xf32, #tpu.memory_space<vmem>>, %arg19: memref<32x32xf32, #tpu.memory_space<vmem>>, %arg20: memref<1x32xf32, #tpu.memory_space<vmem>>, %arg21: memref<32x16xf32, #tpu.memory_space<vmem>>, %arg22: memref<1x16xf32, #tpu.memory_space<vmem>>, %arg23: memref<16x4xf32, #tpu.memory_space<vmem>>, %arg24: memref<1x4xf32, #tpu.memory_space<vmem>>, %arg25: memref<2x4xf32, #tpu.memory_space<vmem>>) attributes {dimension_semantics = [#tpu.dimension_semantics<arbitrary>], iteration_bounds = array<i64: 1>, scalar_prefetch = 0 : i64, scratch_operands = 0 : i64, tpu.core_type = #tpu.core_type<tc>, window_params = [{pipeline_mode = #tpu.pipeline_mode<synchronous>, transform_indices = @transform_0, window_bounds = array<i64: 16, 16>}, {pipeline_mode = #tpu.pipeline_mode<synchronous>, transform_indices = @transform_1, window_bounds = array<i64: 16, 4>}, {pipeline_mode = #tpu.pipeline_mode<synchronous>, transform_indices = @transform_2, window_bounds = array<i64: 16, 16>}, {pipeline_mode = #tpu.pipeline_mode<synchronous>, transform_indices = @transform_3, window_bounds = array<i64: 2, 16>}, {pipeline_mode = #tpu.pipeline_mode<synchronous>, transform_indices = @transform_4, window_bounds = array<i64: 16, 2>}, {pipeline_mode = #tpu.pipeline_mode<synchronous>, transform_indices = @transform_5, window_bounds = array<i64: 4, 32>}, {pipeline_mode = #tpu.pipeline_mode<synchronous>, transform_indices = @transform_6, window_bounds = array<i64: 4, 32>}, {pipeline_mode = #tpu.pipeline_mode<synchronous>, transform_indices = @transform_7, window_bounds = array<i64: 1, 32>}, {pipeline_mode = #tpu.pipeline_mode<synchronous>, transform_indices = @transform_8, window_bounds = array<i64: 32, 32>}, {pipeline_mode = #tpu.pipeline_mode<synchronous>, transform_indices = @transform_9, window_bounds = array<i64: 32, 32>}, {pipeline_mode = #tpu.pipeline_mode<synchronous>, transform_indices = @transform_10, window_bounds = array<i64: 1, 32>}, {pipeline_mode = #tpu.pipeline_mode<synchronous>, transform_indices = @transform_11, window_bounds = array<i64: 32, 32>}, {pipeline_mode = #tpu.pipeline_mode<synchronous>, transform_indices = @transform_12, window_bounds = array<i64: 32, 32>}, {pipeline_mode = #tpu.pipeline_mode<synchronous>, transform_indices = @transform_13, window_bounds = array<i64: 1, 32>}, {pipeline_mode = #tpu.pipeline_mode<synchronous>, transform_indices = @transform_14, window_bounds = array<i64: 1, 32>}, {pipeline_mode = #tpu.pipeline_mode<synchronous>, transform_indices = @transform_15, window_bounds = array<i64: 1, 32>}, {pipeline_mode = #tpu.pipeline_mode<synchronous>, transform_indices = @transform_16, window_bounds = array<i64: 1, 32>}, {pipeline_mode = #tpu.pipeline_mode<synchronous>, transform_indices = @transform_17, window_bounds = array<i64: 32, 32>}, {pipeline_mode = #tpu.pipeline_mode<synchronous>, transform_indices = @transform_18, window_bounds = array<i64: 32, 32>}, {pipeline_mode = #tpu.pipeline_mode<synchronous>, transform_indices = @transform_19, window_bounds = array<i64: 1, 32>}, {pipeline_mode = #tpu.pipeline_mode<synchronous>, transform_indices = @transform_20, window_bounds = array<i64: 32, 16>}, {pipeline_mode = #tpu.pipeline_mode<synchronous>, transform_indices = @transform_21, window_bounds = array<i64: 1, 16>}, {pipeline_mode = #tpu.pipeline_mode<synchronous>, transform_indices = @transform_22, window_bounds = array<i64: 16, 4>}, {pipeline_mode = #tpu.pipeline_mode<synchronous>, transform_indices = @transform_23, window_bounds = array<i64: 1, 4>}, {pipeline_mode = #tpu.pipeline_mode<synchronous>, transform_indices = @transform_24, window_bounds = array<i64: 2, 4>}]} {
    %c0 = arith.constant 0 : index
    %c0_0 = arith.constant 0 : index
    %0 = vector.load %arg1[%c0, %c0_0] : memref<16x16xf32, #tpu.memory_space<vmem>>, vector<16x16xf32>
    %c0_1 = arith.constant 0 : index
    %c0_2 = arith.constant 0 : index
    %1 = vector.load %arg3[%c0_1, %c0_2] : memref<16x16xf32, #tpu.memory_space<vmem>>, vector<16x16xf32>
    %c0_3 = arith.constant 0 : index
    %c0_4 = arith.constant 0 : index
    %2 = vector.load %arg4[%c0_3, %c0_4] : memref<2x16xf32, #tpu.memory_space<vmem>>, vector<2x16xf32>
    %c0_5 = arith.constant 0 : index
    %c0_6 = arith.constant 0 : index
    %3 = vector.load %arg5[%c0_5, %c0_6] : memref<16x2xf32, #tpu.memory_space<vmem>>, vector<16x2xf32>
    %4 = tpu.iota {dimensions = array<i32: 0>} : vector<16x16xi32>
    %5 = tpu.iota {dimensions = array<i32: 1>} : vector<16x16xi32>
    %6 = arith.cmpi eq, %4, %5 : vector<16x16xi32>
    %7 = arith.extui %6 : vector<16x16xi1> to vector<16x16xi32>
    %8 = arith.sitofp %7 : vector<16x16xi32> to vector<16x16xf32>
    %cst = arith.constant 1.000000e+00 : f32
    %9 = vector.broadcast %cst : f32 to vector<16x16xf32>
    %10 = tpu.iota {dimensions = array<i32: 0>} : vector<16x16xi32>
    %11 = tpu.iota {dimensions = array<i32: 1>} : vector<16x16xi32>
    %12 = tpu.iota {dimensions = array<i32: 0>} : vector<2x1xi32>
    %cst_7 = arith.constant 1.000000e+00 : f32
    %13 = vector.broadcast %cst_7 : f32 to vector<16x1xf32>
    %cst_8 = arith.constant 0.000000e+00 : f32
    %14 = vector.broadcast %cst_8 : f32 to vector<2x32xf32>
    %cst_9 = arith.constant 0.000000e+00 : f32
    %15 = vector.broadcast %cst_9 : f32 to vector<2x32xf32>
    %c0_10 = arith.constant 0 : index
    %c0_11 = arith.constant 0 : index
    %16 = vector.load %arg2[%c0_10, %c0_11] : memref<16x4xf32, #tpu.memory_space<vmem>>, vector<16x4xf32>
    %c0_12 = arith.constant 0 : index
    %c0_13 = arith.constant 0 : index
    %17 = vector.load %arg6[%c0_12, %c0_13] : memref<4x32xf32, #tpu.memory_space<vmem>>, vector<4x32xf32>
    %c0_14 = arith.constant 0 : index
    %c0_15 = arith.constant 0 : index
    %18 = vector.load %arg7[%c0_14, %c0_15] : memref<4x32xf32, #tpu.memory_space<vmem>>, vector<4x32xf32>
    %c0_16 = arith.constant 0 : index
    %c0_17 = arith.constant 0 : index
    %19 = vector.load %arg8[%c0_16, %c0_17] : memref<1x32xf32, #tpu.memory_space<vmem>>, vector<1x32xf32>
    %20 = arith.truncf %0 : vector<16x16xf32> to vector<16x16xbf16>
    %21 = arith.truncf %16 : vector<16x4xf32> to vector<16x4xbf16>
    %cst_18 = arith.constant dense<0.000000e+00> : vector<16x4xf32>
    %22 = tpu.matmul %20, %21, %cst_18 {dimension_numbers = #tpu.dot_dimension_numbers<[1], [0], [0], [1], [0, 0, 1, 1], [], []>} : vector<16x16xbf16>, vector<16x4xbf16>, vector<16x4xf32> -> vector<16x4xf32>
    %23 = arith.truncf %16 : vector<16x4xf32> to vector<16x4xbf16>
    %24 = arith.truncf %17 : vector<4x32xf32> to vector<4x32xbf16>
    %cst_19 = arith.constant dense<0.000000e+00> : vector<16x32xf32>
    %25 = tpu.matmul %23, %24, %cst_19 {dimension_numbers = #tpu.dot_dimension_numbers<[1], [0], [0], [1], [0, 0, 1, 1], [], []>} : vector<16x4xbf16>, vector<4x32xbf16>, vector<16x32xf32> -> vector<16x32xf32>
    %26 = arith.truncf %22 : vector<16x4xf32> to vector<16x4xbf16>
    %27 = arith.truncf %18 : vector<4x32xf32> to vector<4x32xbf16>
    %cst_20 = arith.constant dense<0.000000e+00> : vector<16x32xf32>
    %28 = tpu.matmul %26, %27, %cst_20 {dimension_numbers = #tpu.dot_dimension_numbers<[1], [0], [0], [1], [0, 0, 1, 1], [], []>} : vector<16x4xbf16>, vector<4x32xbf16>, vector<16x32xf32> -> vector<16x32xf32>
    %29 = arith.addf %25, %28 : vector<16x32xf32>
    %30 = vector.broadcast %19 : vector<1x32xf32> to vector<16x32xf32>
    %31 = arith.addf %29, %30 : vector<16x32xf32>
    %cst_21 = arith.constant 0.000000e+00 : f32
    %32 = vector.broadcast %cst_21 : f32 to vector<16x32xf32>
    %33 = arith.maximumf %31, %32 : vector<16x32xf32>
    %c0_22 = arith.constant 0 : index
    %c0_23 = arith.constant 0 : index
    %34 = vector.load %arg15[%c0_22, %c0_23] : memref<1x32xf32, #tpu.memory_space<vmem>>, vector<1x32xf32>
    %35 = vector.broadcast %34 : vector<1x32xf32> to vector<16x32xf32>
    %36 = arith.mulf %33, %35 : vector<16x32xf32>
    %cst_24 = arith.constant dense<0.000000e+00> : vector<16xf32>
    %37 = vector.multi_reduction <add>, %36, %cst_24 [1] : vector<16x32xf32> to vector<16xf32>
    %38 = vector.shape_cast %37 : vector<16xf32> to vector<16x1xf32>
    %cst_25 = arith.constant 5.000000e-01 : f32
    %39 = vector.broadcast %cst_25 : f32 to vector<16x1xf32>
    %40 = arith.cmpf ogt, %13, %39 : vector<16x1xf32>
    %cst_26 = arith.constant -1.000000e+30 : f32
    %41 = vector.broadcast %cst_26 : f32 to vector<16x1xf32>
    %42 = arith.select %40, %38, %41 : vector<16x1xi1>, vector<16x1xf32>
    %43 = vector.broadcast %42 : vector<16x1xf32> to vector<16x16xf32>
    %44 = arith.mulf %43, %8 : vector<16x16xf32>
    %cst_27 = arith.constant dense<0.000000e+00> : vector<16x16xf32>
    %45 = tpu.matmul %9, %44, %cst_27 {dimension_numbers = #tpu.dot_dimension_numbers<[1], [0], [0], [1], [0, 0, 1, 1], [], []>} : vector<16x16xf32>, vector<16x16xf32>, vector<16x16xf32> -> vector<16x16xf32>
    %46 = vector.broadcast %42 : vector<16x1xf32> to vector<16x16xf32>
    %47 = arith.cmpf ogt, %45, %46 : vector<16x16xf32>
    %48 = vector.broadcast %42 : vector<16x1xf32> to vector<16x16xf32>
    %49 = arith.cmpf oeq, %45, %48 : vector<16x16xf32>
    %50 = arith.cmpi slt, %11, %10 : vector<16x16xi32>
    %51 = arith.andi %49, %50 : vector<16x16xi1>
    %52 = arith.ori %47, %51 : vector<16x16xi1>
    %53 = arith.extui %52 : vector<16x16xi1> to vector<16x16xi32>
    %54 = arith.sitofp %53 : vector<16x16xi32> to vector<16x16xf32>
    %55 = arith.mulf %1, %54 : vector<16x16xf32>
    %cst_28 = arith.constant dense<0.000000e+00> : vector<16xf32>
    %56 = vector.multi_reduction <add>, %55, %cst_28 [1] : vector<16x16xf32> to vector<16xf32>
    %57 = vector.shape_cast %56 : vector<16xf32> to vector<16x1xf32>
    %cst_29 = arith.constant dense<0.000000e+00> : vector<16x1xf32>
    %58 = tpu.matmul %1, %13, %cst_29 {dimension_numbers = #tpu.dot_dimension_numbers<[1], [0], [0], [1], [0, 0, 1, 1], [], []>} : vector<16x16xf32>, vector<16x1xf32>, vector<16x1xf32> -> vector<16x1xf32>
    %cst_30 = arith.constant 8.000000e-01 : f32
    %59 = vector.broadcast %cst_30 : f32 to vector<16x1xf32>
    %60 = arith.mulf %59, %58 : vector<16x1xf32>
    %61 = arith.cmpf olt, %57, %60 : vector<16x1xf32>
    %62 = arith.extui %61 : vector<16x1xi1> to vector<16x1xi32>
    %63 = arith.sitofp %62 : vector<16x1xi32> to vector<16x1xf32>
    %64 = arith.mulf %13, %63 : vector<16x1xf32>
    %65 = math.tanh %38 : vector<16x1xf32>
    %66 = arith.mulf %65, %64 : vector<16x1xf32>
    %67 = vector.broadcast %66 : vector<16x1xf32> to vector<16x32xf32>
    %68 = arith.mulf %33, %67 : vector<16x32xf32>
    %cst_31 = arith.constant dense<0.000000e+00> : vector<2x1xf32>
    %69 = tpu.matmul %2, %64, %cst_31 {dimension_numbers = #tpu.dot_dimension_numbers<[1], [0], [0], [1], [0, 0, 1, 1], [], []>} : vector<2x16xf32>, vector<16x1xf32>, vector<2x1xf32> -> vector<2x1xf32>
    %70 = arith.truncf %2 : vector<2x16xf32> to vector<2x16xbf16>
    %71 = arith.truncf %68 : vector<16x32xf32> to vector<16x32xbf16>
    %cst_32 = arith.constant dense<0.000000e+00> : vector<2x32xf32>
    %72 = tpu.matmul %70, %71, %cst_32 {dimension_numbers = #tpu.dot_dimension_numbers<[1], [0], [0], [1], [0, 0, 1, 1], [], []>} : vector<2x16xbf16>, vector<16x32xbf16>, vector<2x32xf32> -> vector<2x32xf32>
    %cst_33 = arith.constant 1.000000e+00 : f32
    %73 = vector.broadcast %cst_33 : f32 to vector<2x1xf32>
    %74 = arith.maximumf %69, %73 : vector<2x1xf32>
    %75 = vector.broadcast %74 : vector<2x1xf32> to vector<2x32xf32>
    %76 = arith.divf %72, %75 : vector<2x32xf32>
    %77 = arith.addf %15, %76 : vector<2x32xf32>
    %78 = vector.extract_strided_slice %3 {offsets = [0, 0], sizes = [16, 1], strides = [1, 1]} : vector<16x2xf32> to vector<16x1xf32>
    %79 = arith.mulf %78, %64 : vector<16x1xf32>
    %cst_34 = arith.constant 5.000000e-01 : f32
    %80 = vector.broadcast %cst_34 : f32 to vector<16x1xf32>
    %81 = arith.cmpf ogt, %79, %80 : vector<16x1xf32>
    %cst_35 = arith.constant -1.000000e+30 : f32
    %82 = vector.shape_cast %81 : vector<16x1xi1> to vector<16x1xi1>
    %83 = vector.broadcast %82 : vector<16x1xi1> to vector<16x32xi1>
    %84 = vector.broadcast %cst_35 : f32 to vector<16x32xf32>
    %85 = arith.select %83, %68, %84 : vector<16x32xi1>, vector<16x32xf32>
    %cst_36 = arith.constant dense<0xFF800000> : vector<32xf32>
    %86 = vector.multi_reduction <maximumf>, %85, %cst_36 [0] : vector<16x32xf32> to vector<32xf32>
    %87 = vector.shape_cast %86 : vector<32xf32> to vector<1x32xf32>
    %88 = vector.extract_strided_slice %69 {offsets = [0, 0], sizes = [1, 1], strides = [1, 1]} : vector<2x1xf32> to vector<1x1xf32>
    %cst_37 = arith.constant 5.000000e-01 : f32
    %89 = vector.broadcast %cst_37 : f32 to vector<1x1xf32>
    %90 = arith.cmpf ogt, %88, %89 : vector<1x1xf32>
    %cst_38 = arith.constant 0.000000e+00 : f32
    %91 = vector.shape_cast %90 : vector<1x1xi1> to vector<1x1xi1>
    %92 = vector.broadcast %91 : vector<1x1xi1> to vector<1x32xi1>
    %93 = vector.broadcast %cst_38 : f32 to vector<1x32xf32>
    %94 = arith.select %92, %87, %93 : vector<1x32xi1>, vector<1x32xf32>
    %c0_i32 = arith.constant 0 : i32
    %95 = vector.broadcast %c0_i32 : i32 to vector<2x1xi32>
    %96 = arith.cmpi eq, %12, %95 : vector<2x1xi32>
    %97 = arith.extui %96 : vector<2x1xi1> to vector<2x1xi32>
    %98 = arith.sitofp %97 : vector<2x1xi32> to vector<2x1xf32>
    %99 = vector.broadcast %98 : vector<2x1xf32> to vector<2x32xf32>
    %100 = vector.broadcast %94 : vector<1x32xf32> to vector<2x32xf32>
    %101 = arith.mulf %99, %100 : vector<2x32xf32>
    %102 = arith.addf %14, %101 : vector<2x32xf32>
    %103 = vector.extract_strided_slice %3 {offsets = [0, 1], sizes = [16, 1], strides = [1, 1]} : vector<16x2xf32> to vector<16x1xf32>
    %104 = arith.mulf %103, %64 : vector<16x1xf32>
    %cst_39 = arith.constant 5.000000e-01 : f32
    %105 = vector.broadcast %cst_39 : f32 to vector<16x1xf32>
    %106 = arith.cmpf ogt, %104, %105 : vector<16x1xf32>
    %cst_40 = arith.constant -1.000000e+30 : f32
    %107 = vector.shape_cast %106 : vector<16x1xi1> to vector<16x1xi1>
    %108 = vector.broadcast %107 : vector<16x1xi1> to vector<16x32xi1>
    %109 = vector.broadcast %cst_40 : f32 to vector<16x32xf32>
    %110 = arith.select %108, %68, %109 : vector<16x32xi1>, vector<16x32xf32>
    %cst_41 = arith.constant dense<0xFF800000> : vector<32xf32>
    %111 = vector.multi_reduction <maximumf>, %110, %cst_41 [0] : vector<16x32xf32> to vector<32xf32>
    %112 = vector.shape_cast %111 : vector<32xf32> to vector<1x32xf32>
    %113 = vector.extract_strided_slice %69 {offsets = [1, 0], sizes = [1, 1], strides = [1, 1]} : vector<2x1xf32> to vector<1x1xf32>
    %cst_42 = arith.constant 5.000000e-01 : f32
    %114 = vector.broadcast %cst_42 : f32 to vector<1x1xf32>
    %115 = arith.cmpf ogt, %113, %114 : vector<1x1xf32>
    %cst_43 = arith.constant 0.000000e+00 : f32
    %116 = vector.shape_cast %115 : vector<1x1xi1> to vector<1x1xi1>
    %117 = vector.broadcast %116 : vector<1x1xi1> to vector<1x32xi1>
    %118 = vector.broadcast %cst_43 : f32 to vector<1x32xf32>
    %119 = arith.select %117, %112, %118 : vector<1x32xi1>, vector<1x32xf32>
    %c1_i32 = arith.constant 1 : i32
    %120 = vector.broadcast %c1_i32 : i32 to vector<2x1xi32>
    %121 = arith.cmpi eq, %12, %120 : vector<2x1xi32>
    %122 = arith.extui %121 : vector<2x1xi1> to vector<2x1xi32>
    %123 = arith.sitofp %122 : vector<2x1xi32> to vector<2x1xf32>
    %124 = vector.broadcast %123 : vector<2x1xf32> to vector<2x32xf32>
    %125 = vector.broadcast %119 : vector<1x32xf32> to vector<2x32xf32>
    %126 = arith.mulf %124, %125 : vector<2x32xf32>
    %127 = arith.addf %102, %126 : vector<2x32xf32>
    %c0_44 = arith.constant 0 : index
    %c0_45 = arith.constant 0 : index
    %128 = vector.load %arg9[%c0_44, %c0_45] : memref<32x32xf32, #tpu.memory_space<vmem>>, vector<32x32xf32>
    %c0_46 = arith.constant 0 : index
    %c0_47 = arith.constant 0 : index
    %129 = vector.load %arg10[%c0_46, %c0_47] : memref<32x32xf32, #tpu.memory_space<vmem>>, vector<32x32xf32>
    %c0_48 = arith.constant 0 : index
    %c0_49 = arith.constant 0 : index
    %130 = vector.load %arg11[%c0_48, %c0_49] : memref<1x32xf32, #tpu.memory_space<vmem>>, vector<1x32xf32>
    %131 = arith.truncf %0 : vector<16x16xf32> to vector<16x16xbf16>
    %132 = arith.truncf %68 : vector<16x32xf32> to vector<16x32xbf16>
    %cst_50 = arith.constant dense<0.000000e+00> : vector<16x32xf32>
    %133 = tpu.matmul %131, %132, %cst_50 {dimension_numbers = #tpu.dot_dimension_numbers<[1], [0], [0], [1], [0, 0, 1, 1], [], []>} : vector<16x16xbf16>, vector<16x32xbf16>, vector<16x32xf32> -> vector<16x32xf32>
    %134 = arith.truncf %68 : vector<16x32xf32> to vector<16x32xbf16>
    %135 = arith.truncf %128 : vector<32x32xf32> to vector<32x32xbf16>
    %cst_51 = arith.constant dense<0.000000e+00> : vector<16x32xf32>
    %136 = tpu.matmul %134, %135, %cst_51 {dimension_numbers = #tpu.dot_dimension_numbers<[1], [0], [0], [1], [0, 0, 1, 1], [], []>} : vector<16x32xbf16>, vector<32x32xbf16>, vector<16x32xf32> -> vector<16x32xf32>
    %137 = arith.truncf %133 : vector<16x32xf32> to vector<16x32xbf16>
    %138 = arith.truncf %129 : vector<32x32xf32> to vector<32x32xbf16>
    %cst_52 = arith.constant dense<0.000000e+00> : vector<16x32xf32>
    %139 = tpu.matmul %137, %138, %cst_52 {dimension_numbers = #tpu.dot_dimension_numbers<[1], [0], [0], [1], [0, 0, 1, 1], [], []>} : vector<16x32xbf16>, vector<32x32xbf16>, vector<16x32xf32> -> vector<16x32xf32>
    %140 = arith.addf %136, %139 : vector<16x32xf32>
    %141 = vector.broadcast %130 : vector<1x32xf32> to vector<16x32xf32>
    %142 = arith.addf %140, %141 : vector<16x32xf32>
    %cst_53 = arith.constant 0.000000e+00 : f32
    %143 = vector.broadcast %cst_53 : f32 to vector<16x32xf32>
    %144 = arith.maximumf %142, %143 : vector<16x32xf32>
    %c0_54 = arith.constant 0 : index
    %c0_55 = arith.constant 0 : index
    %145 = vector.load %arg16[%c0_54, %c0_55] : memref<1x32xf32, #tpu.memory_space<vmem>>, vector<1x32xf32>
    %146 = vector.broadcast %145 : vector<1x32xf32> to vector<16x32xf32>
    %147 = arith.mulf %144, %146 : vector<16x32xf32>
    %cst_56 = arith.constant dense<0.000000e+00> : vector<16xf32>
    %148 = vector.multi_reduction <add>, %147, %cst_56 [1] : vector<16x32xf32> to vector<16xf32>
    %149 = vector.shape_cast %148 : vector<16xf32> to vector<16x1xf32>
    %cst_57 = arith.constant 5.000000e-01 : f32
    %150 = vector.broadcast %cst_57 : f32 to vector<16x1xf32>
    %151 = arith.cmpf ogt, %64, %150 : vector<16x1xf32>
    %cst_58 = arith.constant -1.000000e+30 : f32
    %152 = vector.broadcast %cst_58 : f32 to vector<16x1xf32>
    %153 = arith.select %151, %149, %152 : vector<16x1xi1>, vector<16x1xf32>
    %154 = vector.broadcast %153 : vector<16x1xf32> to vector<16x16xf32>
    %155 = arith.mulf %154, %8 : vector<16x16xf32>
    %cst_59 = arith.constant dense<0.000000e+00> : vector<16x16xf32>
    %156 = tpu.matmul %9, %155, %cst_59 {dimension_numbers = #tpu.dot_dimension_numbers<[1], [0], [0], [1], [0, 0, 1, 1], [], []>} : vector<16x16xf32>, vector<16x16xf32>, vector<16x16xf32> -> vector<16x16xf32>
    %157 = vector.broadcast %153 : vector<16x1xf32> to vector<16x16xf32>
    %158 = arith.cmpf ogt, %156, %157 : vector<16x16xf32>
    %159 = vector.broadcast %153 : vector<16x1xf32> to vector<16x16xf32>
    %160 = arith.cmpf oeq, %156, %159 : vector<16x16xf32>
    %161 = arith.cmpi slt, %11, %10 : vector<16x16xi32>
    %162 = arith.andi %160, %161 : vector<16x16xi1>
    %163 = arith.ori %158, %162 : vector<16x16xi1>
    %164 = arith.extui %163 : vector<16x16xi1> to vector<16x16xi32>
    %165 = arith.sitofp %164 : vector<16x16xi32> to vector<16x16xf32>
    %166 = arith.mulf %1, %165 : vector<16x16xf32>
    %cst_60 = arith.constant dense<0.000000e+00> : vector<16xf32>
    %167 = vector.multi_reduction <add>, %166, %cst_60 [1] : vector<16x16xf32> to vector<16xf32>
    %168 = vector.shape_cast %167 : vector<16xf32> to vector<16x1xf32>
    %cst_61 = arith.constant dense<0.000000e+00> : vector<16x1xf32>
    %169 = tpu.matmul %1, %64, %cst_61 {dimension_numbers = #tpu.dot_dimension_numbers<[1], [0], [0], [1], [0, 0, 1, 1], [], []>} : vector<16x16xf32>, vector<16x1xf32>, vector<16x1xf32> -> vector<16x1xf32>
    %cst_62 = arith.constant 8.000000e-01 : f32
    %170 = vector.broadcast %cst_62 : f32 to vector<16x1xf32>
    %171 = arith.mulf %170, %169 : vector<16x1xf32>
    %172 = arith.cmpf olt, %168, %171 : vector<16x1xf32>
    %173 = arith.extui %172 : vector<16x1xi1> to vector<16x1xi32>
    %174 = arith.sitofp %173 : vector<16x1xi32> to vector<16x1xf32>
    %175 = arith.mulf %64, %174 : vector<16x1xf32>
    %176 = math.tanh %149 : vector<16x1xf32>
    %177 = arith.mulf %176, %175 : vector<16x1xf32>
    %178 = vector.broadcast %177 : vector<16x1xf32> to vector<16x32xf32>
    %179 = arith.mulf %144, %178 : vector<16x32xf32>
    %cst_63 = arith.constant dense<0.000000e+00> : vector<2x1xf32>
    %180 = tpu.matmul %2, %175, %cst_63 {dimension_numbers = #tpu.dot_dimension_numbers<[1], [0], [0], [1], [0, 0, 1, 1], [], []>} : vector<2x16xf32>, vector<16x1xf32>, vector<2x1xf32> -> vector<2x1xf32>
    %181 = arith.truncf %2 : vector<2x16xf32> to vector<2x16xbf16>
    %182 = arith.truncf %179 : vector<16x32xf32> to vector<16x32xbf16>
    %cst_64 = arith.constant dense<0.000000e+00> : vector<2x32xf32>
    %183 = tpu.matmul %181, %182, %cst_64 {dimension_numbers = #tpu.dot_dimension_numbers<[1], [0], [0], [1], [0, 0, 1, 1], [], []>} : vector<2x16xbf16>, vector<16x32xbf16>, vector<2x32xf32> -> vector<2x32xf32>
    %cst_65 = arith.constant 1.000000e+00 : f32
    %184 = vector.broadcast %cst_65 : f32 to vector<2x1xf32>
    %185 = arith.maximumf %180, %184 : vector<2x1xf32>
    %186 = vector.broadcast %185 : vector<2x1xf32> to vector<2x32xf32>
    %187 = arith.divf %183, %186 : vector<2x32xf32>
    %188 = arith.addf %77, %187 : vector<2x32xf32>
    %189 = vector.extract_strided_slice %3 {offsets = [0, 0], sizes = [16, 1], strides = [1, 1]} : vector<16x2xf32> to vector<16x1xf32>
    %190 = arith.mulf %189, %175 : vector<16x1xf32>
    %cst_66 = arith.constant 5.000000e-01 : f32
    %191 = vector.broadcast %cst_66 : f32 to vector<16x1xf32>
    %192 = arith.cmpf ogt, %190, %191 : vector<16x1xf32>
    %cst_67 = arith.constant -1.000000e+30 : f32
    %193 = vector.shape_cast %192 : vector<16x1xi1> to vector<16x1xi1>
    %194 = vector.broadcast %193 : vector<16x1xi1> to vector<16x32xi1>
    %195 = vector.broadcast %cst_67 : f32 to vector<16x32xf32>
    %196 = arith.select %194, %179, %195 : vector<16x32xi1>, vector<16x32xf32>
    %cst_68 = arith.constant dense<0xFF800000> : vector<32xf32>
    %197 = vector.multi_reduction <maximumf>, %196, %cst_68 [0] : vector<16x32xf32> to vector<32xf32>
    %198 = vector.shape_cast %197 : vector<32xf32> to vector<1x32xf32>
    %199 = vector.extract_strided_slice %180 {offsets = [0, 0], sizes = [1, 1], strides = [1, 1]} : vector<2x1xf32> to vector<1x1xf32>
    %cst_69 = arith.constant 5.000000e-01 : f32
    %200 = vector.broadcast %cst_69 : f32 to vector<1x1xf32>
    %201 = arith.cmpf ogt, %199, %200 : vector<1x1xf32>
    %cst_70 = arith.constant 0.000000e+00 : f32
    %202 = vector.shape_cast %201 : vector<1x1xi1> to vector<1x1xi1>
    %203 = vector.broadcast %202 : vector<1x1xi1> to vector<1x32xi1>
    %204 = vector.broadcast %cst_70 : f32 to vector<1x32xf32>
    %205 = arith.select %203, %198, %204 : vector<1x32xi1>, vector<1x32xf32>
    %c0_i32_71 = arith.constant 0 : i32
    %206 = vector.broadcast %c0_i32_71 : i32 to vector<2x1xi32>
    %207 = arith.cmpi eq, %12, %206 : vector<2x1xi32>
    %208 = arith.extui %207 : vector<2x1xi1> to vector<2x1xi32>
    %209 = arith.sitofp %208 : vector<2x1xi32> to vector<2x1xf32>
    %210 = vector.broadcast %209 : vector<2x1xf32> to vector<2x32xf32>
    %211 = vector.broadcast %205 : vector<1x32xf32> to vector<2x32xf32>
    %212 = arith.mulf %210, %211 : vector<2x32xf32>
    %213 = arith.addf %127, %212 : vector<2x32xf32>
    %214 = vector.extract_strided_slice %3 {offsets = [0, 1], sizes = [16, 1], strides = [1, 1]} : vector<16x2xf32> to vector<16x1xf32>
    %215 = arith.mulf %214, %175 : vector<16x1xf32>
    %cst_72 = arith.constant 5.000000e-01 : f32
    %216 = vector.broadcast %cst_72 : f32 to vector<16x1xf32>
    %217 = arith.cmpf ogt, %215, %216 : vector<16x1xf32>
    %cst_73 = arith.constant -1.000000e+30 : f32
    %218 = vector.shape_cast %217 : vector<16x1xi1> to vector<16x1xi1>
    %219 = vector.broadcast %218 : vector<16x1xi1> to vector<16x32xi1>
    %220 = vector.broadcast %cst_73 : f32 to vector<16x32xf32>
    %221 = arith.select %219, %179, %220 : vector<16x32xi1>, vector<16x32xf32>
    %cst_74 = arith.constant dense<0xFF800000> : vector<32xf32>
    %222 = vector.multi_reduction <maximumf>, %221, %cst_74 [0] : vector<16x32xf32> to vector<32xf32>
    %223 = vector.shape_cast %222 : vector<32xf32> to vector<1x32xf32>
    %224 = vector.extract_strided_slice %180 {offsets = [1, 0], sizes = [1, 1], strides = [1, 1]} : vector<2x1xf32> to vector<1x1xf32>
    %cst_75 = arith.constant 5.000000e-01 : f32
    %225 = vector.broadcast %cst_75 : f32 to vector<1x1xf32>
    %226 = arith.cmpf ogt, %224, %225 : vector<1x1xf32>
    %cst_76 = arith.constant 0.000000e+00 : f32
    %227 = vector.shape_cast %226 : vector<1x1xi1> to vector<1x1xi1>
    %228 = vector.broadcast %227 : vector<1x1xi1> to vector<1x32xi1>
    %229 = vector.broadcast %cst_76 : f32 to vector<1x32xf32>
    %230 = arith.select %228, %223, %229 : vector<1x32xi1>, vector<1x32xf32>
    %c1_i32_77 = arith.constant 1 : i32
    %231 = vector.broadcast %c1_i32_77 : i32 to vector<2x1xi32>
    %232 = arith.cmpi eq, %12, %231 : vector<2x1xi32>
    %233 = arith.extui %232 : vector<2x1xi1> to vector<2x1xi32>
    %234 = arith.sitofp %233 : vector<2x1xi32> to vector<2x1xf32>
    %235 = vector.broadcast %234 : vector<2x1xf32> to vector<2x32xf32>
    %236 = vector.broadcast %230 : vector<1x32xf32> to vector<2x32xf32>
    %237 = arith.mulf %235, %236 : vector<2x32xf32>
    %238 = arith.addf %213, %237 : vector<2x32xf32>
    %c0_78 = arith.constant 0 : index
    %c0_79 = arith.constant 0 : index
    %239 = vector.load %arg12[%c0_78, %c0_79] : memref<32x32xf32, #tpu.memory_space<vmem>>, vector<32x32xf32>
    %c0_80 = arith.constant 0 : index
    %c0_81 = arith.constant 0 : index
    %240 = vector.load %arg13[%c0_80, %c0_81] : memref<32x32xf32, #tpu.memory_space<vmem>>, vector<32x32xf32>
    %c0_82 = arith.constant 0 : index
    %c0_83 = arith.constant 0 : index
    %241 = vector.load %arg14[%c0_82, %c0_83] : memref<1x32xf32, #tpu.memory_space<vmem>>, vector<1x32xf32>
    %242 = arith.truncf %0 : vector<16x16xf32> to vector<16x16xbf16>
    %243 = arith.truncf %179 : vector<16x32xf32> to vector<16x32xbf16>
    %cst_84 = arith.constant dense<0.000000e+00> : vector<16x32xf32>
    %244 = tpu.matmul %242, %243, %cst_84 {dimension_numbers = #tpu.dot_dimension_numbers<[1], [0], [0], [1], [0, 0, 1, 1], [], []>} : vector<16x16xbf16>, vector<16x32xbf16>, vector<16x32xf32> -> vector<16x32xf32>
    %245 = arith.truncf %179 : vector<16x32xf32> to vector<16x32xbf16>
    %246 = arith.truncf %239 : vector<32x32xf32> to vector<32x32xbf16>
    %cst_85 = arith.constant dense<0.000000e+00> : vector<16x32xf32>
    %247 = tpu.matmul %245, %246, %cst_85 {dimension_numbers = #tpu.dot_dimension_numbers<[1], [0], [0], [1], [0, 0, 1, 1], [], []>} : vector<16x32xbf16>, vector<32x32xbf16>, vector<16x32xf32> -> vector<16x32xf32>
    %248 = arith.truncf %244 : vector<16x32xf32> to vector<16x32xbf16>
    %249 = arith.truncf %240 : vector<32x32xf32> to vector<32x32xbf16>
    %cst_86 = arith.constant dense<0.000000e+00> : vector<16x32xf32>
    %250 = tpu.matmul %248, %249, %cst_86 {dimension_numbers = #tpu.dot_dimension_numbers<[1], [0], [0], [1], [0, 0, 1, 1], [], []>} : vector<16x32xbf16>, vector<32x32xbf16>, vector<16x32xf32> -> vector<16x32xf32>
    %251 = arith.addf %247, %250 : vector<16x32xf32>
    %252 = vector.broadcast %241 : vector<1x32xf32> to vector<16x32xf32>
    %253 = arith.addf %251, %252 : vector<16x32xf32>
    %cst_87 = arith.constant 0.000000e+00 : f32
    %254 = vector.broadcast %cst_87 : f32 to vector<16x32xf32>
    %255 = arith.maximumf %253, %254 : vector<16x32xf32>
    %c0_88 = arith.constant 0 : index
    %c0_89 = arith.constant 0 : index
    %256 = vector.load %arg17[%c0_88, %c0_89] : memref<1x32xf32, #tpu.memory_space<vmem>>, vector<1x32xf32>
    %257 = vector.broadcast %256 : vector<1x32xf32> to vector<16x32xf32>
    %258 = arith.mulf %255, %257 : vector<16x32xf32>
    %cst_90 = arith.constant dense<0.000000e+00> : vector<16xf32>
    %259 = vector.multi_reduction <add>, %258, %cst_90 [1] : vector<16x32xf32> to vector<16xf32>
    %260 = vector.shape_cast %259 : vector<16xf32> to vector<16x1xf32>
    %cst_91 = arith.constant 5.000000e-01 : f32
    %261 = vector.broadcast %cst_91 : f32 to vector<16x1xf32>
    %262 = arith.cmpf ogt, %175, %261 : vector<16x1xf32>
    %cst_92 = arith.constant -1.000000e+30 : f32
    %263 = vector.broadcast %cst_92 : f32 to vector<16x1xf32>
    %264 = arith.select %262, %260, %263 : vector<16x1xi1>, vector<16x1xf32>
    %265 = vector.broadcast %264 : vector<16x1xf32> to vector<16x16xf32>
    %266 = arith.mulf %265, %8 : vector<16x16xf32>
    %cst_93 = arith.constant dense<0.000000e+00> : vector<16x16xf32>
    %267 = tpu.matmul %9, %266, %cst_93 {dimension_numbers = #tpu.dot_dimension_numbers<[1], [0], [0], [1], [0, 0, 1, 1], [], []>} : vector<16x16xf32>, vector<16x16xf32>, vector<16x16xf32> -> vector<16x16xf32>
    %268 = vector.broadcast %264 : vector<16x1xf32> to vector<16x16xf32>
    %269 = arith.cmpf ogt, %267, %268 : vector<16x16xf32>
    %270 = vector.broadcast %264 : vector<16x1xf32> to vector<16x16xf32>
    %271 = arith.cmpf oeq, %267, %270 : vector<16x16xf32>
    %272 = arith.cmpi slt, %11, %10 : vector<16x16xi32>
    %273 = arith.andi %271, %272 : vector<16x16xi1>
    %274 = arith.ori %269, %273 : vector<16x16xi1>
    %275 = arith.extui %274 : vector<16x16xi1> to vector<16x16xi32>
    %276 = arith.sitofp %275 : vector<16x16xi32> to vector<16x16xf32>
    %277 = arith.mulf %1, %276 : vector<16x16xf32>
    %cst_94 = arith.constant dense<0.000000e+00> : vector<16xf32>
    %278 = vector.multi_reduction <add>, %277, %cst_94 [1] : vector<16x16xf32> to vector<16xf32>
    %279 = vector.shape_cast %278 : vector<16xf32> to vector<16x1xf32>
    %cst_95 = arith.constant dense<0.000000e+00> : vector<16x1xf32>
    %280 = tpu.matmul %1, %175, %cst_95 {dimension_numbers = #tpu.dot_dimension_numbers<[1], [0], [0], [1], [0, 0, 1, 1], [], []>} : vector<16x16xf32>, vector<16x1xf32>, vector<16x1xf32> -> vector<16x1xf32>
    %cst_96 = arith.constant 8.000000e-01 : f32
    %281 = vector.broadcast %cst_96 : f32 to vector<16x1xf32>
    %282 = arith.mulf %281, %280 : vector<16x1xf32>
    %283 = arith.cmpf olt, %279, %282 : vector<16x1xf32>
    %284 = arith.extui %283 : vector<16x1xi1> to vector<16x1xi32>
    %285 = arith.sitofp %284 : vector<16x1xi32> to vector<16x1xf32>
    %286 = arith.mulf %175, %285 : vector<16x1xf32>
    %287 = math.tanh %260 : vector<16x1xf32>
    %288 = arith.mulf %287, %286 : vector<16x1xf32>
    %289 = vector.broadcast %288 : vector<16x1xf32> to vector<16x32xf32>
    %290 = arith.mulf %255, %289 : vector<16x32xf32>
    %cst_97 = arith.constant dense<0.000000e+00> : vector<2x1xf32>
    %291 = tpu.matmul %2, %286, %cst_97 {dimension_numbers = #tpu.dot_dimension_numbers<[1], [0], [0], [1], [0, 0, 1, 1], [], []>} : vector<2x16xf32>, vector<16x1xf32>, vector<2x1xf32> -> vector<2x1xf32>
    %292 = arith.truncf %2 : vector<2x16xf32> to vector<2x16xbf16>
    %293 = arith.truncf %290 : vector<16x32xf32> to vector<16x32xbf16>
    %cst_98 = arith.constant dense<0.000000e+00> : vector<2x32xf32>
    %294 = tpu.matmul %292, %293, %cst_98 {dimension_numbers = #tpu.dot_dimension_numbers<[1], [0], [0], [1], [0, 0, 1, 1], [], []>} : vector<2x16xbf16>, vector<16x32xbf16>, vector<2x32xf32> -> vector<2x32xf32>
    %cst_99 = arith.constant 1.000000e+00 : f32
    %295 = vector.broadcast %cst_99 : f32 to vector<2x1xf32>
    %296 = arith.maximumf %291, %295 : vector<2x1xf32>
    %297 = vector.broadcast %296 : vector<2x1xf32> to vector<2x32xf32>
    %298 = arith.divf %294, %297 : vector<2x32xf32>
    %299 = arith.addf %188, %298 : vector<2x32xf32>
    %300 = vector.extract_strided_slice %3 {offsets = [0, 0], sizes = [16, 1], strides = [1, 1]} : vector<16x2xf32> to vector<16x1xf32>
    %301 = arith.mulf %300, %286 : vector<16x1xf32>
    %cst_100 = arith.constant 5.000000e-01 : f32
    %302 = vector.broadcast %cst_100 : f32 to vector<16x1xf32>
    %303 = arith.cmpf ogt, %301, %302 : vector<16x1xf32>
    %cst_101 = arith.constant -1.000000e+30 : f32
    %304 = vector.shape_cast %303 : vector<16x1xi1> to vector<16x1xi1>
    %305 = vector.broadcast %304 : vector<16x1xi1> to vector<16x32xi1>
    %306 = vector.broadcast %cst_101 : f32 to vector<16x32xf32>
    %307 = arith.select %305, %290, %306 : vector<16x32xi1>, vector<16x32xf32>
    %cst_102 = arith.constant dense<0xFF800000> : vector<32xf32>
    %308 = vector.multi_reduction <maximumf>, %307, %cst_102 [0] : vector<16x32xf32> to vector<32xf32>
    %309 = vector.shape_cast %308 : vector<32xf32> to vector<1x32xf32>
    %310 = vector.extract_strided_slice %291 {offsets = [0, 0], sizes = [1, 1], strides = [1, 1]} : vector<2x1xf32> to vector<1x1xf32>
    %cst_103 = arith.constant 5.000000e-01 : f32
    %311 = vector.broadcast %cst_103 : f32 to vector<1x1xf32>
    %312 = arith.cmpf ogt, %310, %311 : vector<1x1xf32>
    %cst_104 = arith.constant 0.000000e+00 : f32
    %313 = vector.shape_cast %312 : vector<1x1xi1> to vector<1x1xi1>
    %314 = vector.broadcast %313 : vector<1x1xi1> to vector<1x32xi1>
    %315 = vector.broadcast %cst_104 : f32 to vector<1x32xf32>
    %316 = arith.select %314, %309, %315 : vector<1x32xi1>, vector<1x32xf32>
    %c0_i32_105 = arith.constant 0 : i32
    %317 = vector.broadcast %c0_i32_105 : i32 to vector<2x1xi32>
    %318 = arith.cmpi eq, %12, %317 : vector<2x1xi32>
    %319 = arith.extui %318 : vector<2x1xi1> to vector<2x1xi32>
    %320 = arith.sitofp %319 : vector<2x1xi32> to vector<2x1xf32>
    %321 = vector.broadcast %320 : vector<2x1xf32> to vector<2x32xf32>
    %322 = vector.broadcast %316 : vector<1x32xf32> to vector<2x32xf32>
    %323 = arith.mulf %321, %322 : vector<2x32xf32>
    %324 = arith.addf %238, %323 : vector<2x32xf32>
    %325 = vector.extract_strided_slice %3 {offsets = [0, 1], sizes = [16, 1], strides = [1, 1]} : vector<16x2xf32> to vector<16x1xf32>
    %326 = arith.mulf %325, %286 : vector<16x1xf32>
    %cst_106 = arith.constant 5.000000e-01 : f32
    %327 = vector.broadcast %cst_106 : f32 to vector<16x1xf32>
    %328 = arith.cmpf ogt, %326, %327 : vector<16x1xf32>
    %cst_107 = arith.constant -1.000000e+30 : f32
    %329 = vector.shape_cast %328 : vector<16x1xi1> to vector<16x1xi1>
    %330 = vector.broadcast %329 : vector<16x1xi1> to vector<16x32xi1>
    %331 = vector.broadcast %cst_107 : f32 to vector<16x32xf32>
    %332 = arith.select %330, %290, %331 : vector<16x32xi1>, vector<16x32xf32>
    %cst_108 = arith.constant dense<0xFF800000> : vector<32xf32>
    %333 = vector.multi_reduction <maximumf>, %332, %cst_108 [0] : vector<16x32xf32> to vector<32xf32>
    %334 = vector.shape_cast %333 : vector<32xf32> to vector<1x32xf32>
    %335 = vector.extract_strided_slice %291 {offsets = [1, 0], sizes = [1, 1], strides = [1, 1]} : vector<2x1xf32> to vector<1x1xf32>
    %cst_109 = arith.constant 5.000000e-01 : f32
    %336 = vector.broadcast %cst_109 : f32 to vector<1x1xf32>
    %337 = arith.cmpf ogt, %335, %336 : vector<1x1xf32>
    %cst_110 = arith.constant 0.000000e+00 : f32
    %338 = vector.shape_cast %337 : vector<1x1xi1> to vector<1x1xi1>
    %339 = vector.broadcast %338 : vector<1x1xi1> to vector<1x32xi1>
    %340 = vector.broadcast %cst_110 : f32 to vector<1x32xf32>
    %341 = arith.select %339, %334, %340 : vector<1x32xi1>, vector<1x32xf32>
    %c1_i32_111 = arith.constant 1 : i32
    %342 = vector.broadcast %c1_i32_111 : i32 to vector<2x1xi32>
    %343 = arith.cmpi eq, %12, %342 : vector<2x1xi32>
    %344 = arith.extui %343 : vector<2x1xi1> to vector<2x1xi32>
    %345 = arith.sitofp %344 : vector<2x1xi32> to vector<2x1xf32>
    %346 = vector.broadcast %345 : vector<2x1xf32> to vector<2x32xf32>
    %347 = vector.broadcast %341 : vector<1x32xf32> to vector<2x32xf32>
    %348 = arith.mulf %346, %347 : vector<2x32xf32>
    %349 = arith.addf %324, %348 : vector<2x32xf32>
    %c0_112 = arith.constant 0 : index
    %c0_113 = arith.constant 0 : index
    %350 = vector.load %arg18[%c0_112, %c0_113] : memref<32x32xf32, #tpu.memory_space<vmem>>, vector<32x32xf32>
    %351 = arith.truncf %349 : vector<2x32xf32> to vector<2x32xbf16>
    %352 = arith.truncf %350 : vector<32x32xf32> to vector<32x32xbf16>
    %cst_114 = arith.constant dense<0.000000e+00> : vector<2x32xf32>
    %353 = tpu.matmul %351, %352, %cst_114 {dimension_numbers = #tpu.dot_dimension_numbers<[1], [0], [0], [1], [0, 0, 1, 1], [], []>} : vector<2x32xbf16>, vector<32x32xbf16>, vector<2x32xf32> -> vector<2x32xf32>
    %c0_115 = arith.constant 0 : index
    %c0_116 = arith.constant 0 : index
    %354 = vector.load %arg19[%c0_115, %c0_116] : memref<32x32xf32, #tpu.memory_space<vmem>>, vector<32x32xf32>
    %355 = arith.truncf %299 : vector<2x32xf32> to vector<2x32xbf16>
    %356 = arith.truncf %354 : vector<32x32xf32> to vector<32x32xbf16>
    %cst_117 = arith.constant dense<0.000000e+00> : vector<2x32xf32>
    %357 = tpu.matmul %355, %356, %cst_117 {dimension_numbers = #tpu.dot_dimension_numbers<[1], [0], [0], [1], [0, 0, 1, 1], [], []>} : vector<2x32xbf16>, vector<32x32xbf16>, vector<2x32xf32> -> vector<2x32xf32>
    %358 = arith.addf %353, %357 : vector<2x32xf32>
    %c0_118 = arith.constant 0 : index
    %c0_119 = arith.constant 0 : index
    %359 = vector.load %arg20[%c0_118, %c0_119] : memref<1x32xf32, #tpu.memory_space<vmem>>, vector<1x32xf32>
    %360 = vector.broadcast %359 : vector<1x32xf32> to vector<2x32xf32>
    %361 = arith.addf %358, %360 : vector<2x32xf32>
    %cst_120 = arith.constant 0.000000e+00 : f32
    %362 = vector.broadcast %cst_120 : f32 to vector<2x32xf32>
    %363 = arith.maximumf %361, %362 : vector<2x32xf32>
    %c0_121 = arith.constant 0 : index
    %c0_122 = arith.constant 0 : index
    %364 = vector.load %arg21[%c0_121, %c0_122] : memref<32x16xf32, #tpu.memory_space<vmem>>, vector<32x16xf32>
    %365 = arith.truncf %363 : vector<2x32xf32> to vector<2x32xbf16>
    %366 = arith.truncf %364 : vector<32x16xf32> to vector<32x16xbf16>
    %cst_123 = arith.constant dense<0.000000e+00> : vector<2x16xf32>
    %367 = tpu.matmul %365, %366, %cst_123 {dimension_numbers = #tpu.dot_dimension_numbers<[1], [0], [0], [1], [0, 0, 1, 1], [], []>} : vector<2x32xbf16>, vector<32x16xbf16>, vector<2x16xf32> -> vector<2x16xf32>
    %c0_124 = arith.constant 0 : index
    %c0_125 = arith.constant 0 : index
    %368 = vector.load %arg22[%c0_124, %c0_125] : memref<1x16xf32, #tpu.memory_space<vmem>>, vector<1x16xf32>
    %369 = vector.broadcast %368 : vector<1x16xf32> to vector<2x16xf32>
    %370 = arith.addf %367, %369 : vector<2x16xf32>
    %cst_126 = arith.constant 0.000000e+00 : f32
    %371 = vector.broadcast %cst_126 : f32 to vector<2x16xf32>
    %372 = arith.maximumf %370, %371 : vector<2x16xf32>
    %c0_127 = arith.constant 0 : index
    %c0_128 = arith.constant 0 : index
    %373 = vector.load %arg23[%c0_127, %c0_128] : memref<16x4xf32, #tpu.memory_space<vmem>>, vector<16x4xf32>
    %374 = arith.truncf %372 : vector<2x16xf32> to vector<2x16xbf16>
    %375 = arith.truncf %373 : vector<16x4xf32> to vector<16x4xbf16>
    %cst_129 = arith.constant dense<0.000000e+00> : vector<2x4xf32>
    %376 = tpu.matmul %374, %375, %cst_129 {dimension_numbers = #tpu.dot_dimension_numbers<[1], [0], [0], [1], [0, 0, 1, 1], [], []>} : vector<2x16xbf16>, vector<16x4xbf16>, vector<2x4xf32> -> vector<2x4xf32>
    %c0_130 = arith.constant 0 : index
    %c0_131 = arith.constant 0 : index
    %377 = vector.load %arg24[%c0_130, %c0_131] : memref<1x4xf32, #tpu.memory_space<vmem>>, vector<1x4xf32>
    %378 = vector.broadcast %377 : vector<1x4xf32> to vector<2x4xf32>
    %379 = arith.addf %376, %378 : vector<2x4xf32>
    %cst_132 = arith.constant dense<0xFF800000> : vector<2xf32>
    %380 = vector.multi_reduction <maximumf>, %379, %cst_132 [1] : vector<2x4xf32> to vector<2xf32>
    %381 = vector.shape_cast %380 : vector<2xf32> to vector<2x1xf32>
    %382 = vector.broadcast %381 : vector<2x1xf32> to vector<2x4xf32>
    %383 = arith.subf %379, %382 : vector<2x4xf32>
    %384 = math.exp %383 : vector<2x4xf32>
    %cst_133 = arith.constant dense<0.000000e+00> : vector<2xf32>
    %385 = vector.multi_reduction <add>, %384, %cst_133 [1] : vector<2x4xf32> to vector<2xf32>
    %386 = vector.shape_cast %385 : vector<2xf32> to vector<2x1xf32>
    %387 = math.log %386 : vector<2x1xf32>
    %388 = vector.broadcast %387 : vector<2x1xf32> to vector<2x4xf32>
    %389 = arith.subf %383, %388 : vector<2x4xf32>
    %c0_134 = arith.constant 0 : index
    %c0_135 = arith.constant 0 : index
    %390 = vector.load %arg25[%c0_134, %c0_135] : memref<2x4xf32, #tpu.memory_space<vmem>>, vector<2x4xf32>
    tpu.vector_store %arg25[%c0_134, %c0_135], %389 {strides = array<i32>} : memref<2x4xf32, #tpu.memory_space<vmem>>, vector<2x4xf32>,
    return
  }
  func.func @transform_0(%arg0: i32) -> (i32, i32) {
    %c0_i32 = arith.constant 0 : i32
    %c0_i32_0 = arith.constant 0 : i32
    %c0_i32_1 = arith.constant 0 : i32
    return %c0_i32, %c0_i32_0 : i32, i32
  }
  func.func @transform_1(%arg0: i32) -> (i32, i32) {
    %c0_i32 = arith.constant 0 : i32
    %c0_i32_0 = arith.constant 0 : i32
    %c0_i32_1 = arith.constant 0 : i32
    return %c0_i32, %c0_i32_0 : i32, i32
  }
  func.func @transform_2(%arg0: i32) -> (i32, i32) {
    %c0_i32 = arith.constant 0 : i32
    %c0_i32_0 = arith.constant 0 : i32
    %c0_i32_1 = arith.constant 0 : i32
    return %c0_i32, %c0_i32_0 : i32, i32
  }
  func.func @transform_3(%arg0: i32) -> (i32, i32) {
    %c0_i32 = arith.constant 0 : i32
    %c0_i32_0 = arith.constant 0 : i32
    %c0_i32_1 = arith.constant 0 : i32
    return %c0_i32, %c0_i32_0 : i32, i32
  }
  func.func @transform_4(%arg0: i32) -> (i32, i32) {
    %c0_i32 = arith.constant 0 : i32
    %c0_i32_0 = arith.constant 0 : i32
    %c0_i32_1 = arith.constant 0 : i32
    return %c0_i32, %c0_i32_0 : i32, i32
  }
  func.func @transform_5(%arg0: i32) -> (i32, i32) {
    %c0_i32 = arith.constant 0 : i32
    %c0_i32_0 = arith.constant 0 : i32
    %c0_i32_1 = arith.constant 0 : i32
    return %c0_i32, %c0_i32_0 : i32, i32
  }
  func.func @transform_6(%arg0: i32) -> (i32, i32) {
    %c0_i32 = arith.constant 0 : i32
    %c0_i32_0 = arith.constant 0 : i32
    %c0_i32_1 = arith.constant 0 : i32
    return %c0_i32, %c0_i32_0 : i32, i32
  }
  func.func @transform_7(%arg0: i32) -> (i32, i32) {
    %c0_i32 = arith.constant 0 : i32
    %c0_i32_0 = arith.constant 0 : i32
    %c0_i32_1 = arith.constant 0 : i32
    return %c0_i32, %c0_i32_0 : i32, i32
  }
  func.func @transform_8(%arg0: i32) -> (i32, i32) {
    %c0_i32 = arith.constant 0 : i32
    %c0_i32_0 = arith.constant 0 : i32
    %c0_i32_1 = arith.constant 0 : i32
    return %c0_i32, %c0_i32_0 : i32, i32
  }
  func.func @transform_9(%arg0: i32) -> (i32, i32) {
    %c0_i32 = arith.constant 0 : i32
    %c0_i32_0 = arith.constant 0 : i32
    %c0_i32_1 = arith.constant 0 : i32
    return %c0_i32, %c0_i32_0 : i32, i32
  }
  func.func @transform_10(%arg0: i32) -> (i32, i32) {
    %c0_i32 = arith.constant 0 : i32
    %c0_i32_0 = arith.constant 0 : i32
    %c0_i32_1 = arith.constant 0 : i32
    return %c0_i32, %c0_i32_0 : i32, i32
  }
  func.func @transform_11(%arg0: i32) -> (i32, i32) {
    %c0_i32 = arith.constant 0 : i32
    %c0_i32_0 = arith.constant 0 : i32
    %c0_i32_1 = arith.constant 0 : i32
    return %c0_i32, %c0_i32_0 : i32, i32
  }
  func.func @transform_12(%arg0: i32) -> (i32, i32) {
    %c0_i32 = arith.constant 0 : i32
    %c0_i32_0 = arith.constant 0 : i32
    %c0_i32_1 = arith.constant 0 : i32
    return %c0_i32, %c0_i32_0 : i32, i32
  }
  func.func @transform_13(%arg0: i32) -> (i32, i32) {
    %c0_i32 = arith.constant 0 : i32
    %c0_i32_0 = arith.constant 0 : i32
    %c0_i32_1 = arith.constant 0 : i32
    return %c0_i32, %c0_i32_0 : i32, i32
  }
  func.func @transform_14(%arg0: i32) -> (i32, i32) {
    %c0_i32 = arith.constant 0 : i32
    %c0_i32_0 = arith.constant 0 : i32
    %c0_i32_1 = arith.constant 0 : i32
    return %c0_i32, %c0_i32_0 : i32, i32
  }
  func.func @transform_15(%arg0: i32) -> (i32, i32) {
    %c0_i32 = arith.constant 0 : i32
    %c0_i32_0 = arith.constant 0 : i32
    %c0_i32_1 = arith.constant 0 : i32
    return %c0_i32, %c0_i32_0 : i32, i32
  }
  func.func @transform_16(%arg0: i32) -> (i32, i32) {
    %c0_i32 = arith.constant 0 : i32
    %c0_i32_0 = arith.constant 0 : i32
    %c0_i32_1 = arith.constant 0 : i32
    return %c0_i32, %c0_i32_0 : i32, i32
  }
  func.func @transform_17(%arg0: i32) -> (i32, i32) {
    %c0_i32 = arith.constant 0 : i32
    %c0_i32_0 = arith.constant 0 : i32
    %c0_i32_1 = arith.constant 0 : i32
    return %c0_i32, %c0_i32_0 : i32, i32
  }
  func.func @transform_18(%arg0: i32) -> (i32, i32) {
    %c0_i32 = arith.constant 0 : i32
    %c0_i32_0 = arith.constant 0 : i32
    %c0_i32_1 = arith.constant 0 : i32
    return %c0_i32, %c0_i32_0 : i32, i32
  }
  func.func @transform_19(%arg0: i32) -> (i32, i32) {
    %c0_i32 = arith.constant 0 : i32
    %c0_i32_0 = arith.constant 0 : i32
    %c0_i32_1 = arith.constant 0 : i32
    return %c0_i32, %c0_i32_0 : i32, i32
  }
  func.func @transform_20(%arg0: i32) -> (i32, i32) {
    %c0_i32 = arith.constant 0 : i32
    %c0_i32_0 = arith.constant 0 : i32
    %c0_i32_1 = arith.constant 0 : i32
    return %c0_i32, %c0_i32_0 : i32, i32
  }
  func.func @transform_21(%arg0: i32) -> (i32, i32) {
    %c0_i32 = arith.constant 0 : i32
    %c0_i32_0 = arith.constant 0 : i32
    %c0_i32_1 = arith.constant 0 : i32
    return %c0_i32, %c0_i32_0 : i32, i32
  }
  func.func @transform_22(%arg0: i32) -> (i32, i32) {
    %c0_i32 = arith.constant 0 : i32
    %c0_i32_0 = arith.constant 0 : i32
    %c0_i32_1 = arith.constant 0 : i32
    return %c0_i32, %c0_i32_0 : i32, i32
  }
  func.func @transform_23(%arg0: i32) -> (i32, i32) {
    %c0_i32 = arith.constant 0 : i32
    %c0_i32_0 = arith.constant 0 : i32
    %c0_i32_1 = arith.constant 0 : i32
    return %c0_i32, %c0_i32_0 : i32, i32
  }
  func.func @transform_24(%arg0: i32) -> (i32, i32) {
    %c0_i32 = arith.constant 0 : i32
    %c0_i32_0 = arith.constant 0 : i32
    %c0_i32_1 = arith.constant 0 : i32
    return %c0_i32, %c0_i32_0 : i32, i32
  }
}

</mosaic_0001>

<bundles_post_ra>
// kernel: gpoolnet_forward.1
= control target key start
LH: loop header
LB: loop body
LE: loop exit
PB: predicated region body
PF: predicated region fallthrough
CT: control target
= control target key end

     0   :  { %s3208_s0 = inlined_call_operand.vmem [shape: f32[16,16], index: 0, kind: input, shape index: {}]   ;;  %s3209_s1 = inlined_call_operand.vmem [shape: f32[16,4], index: 1, kind: input, shape index: {}]   ;;  %s3210_s2 = inlined_call_operand.vmem [shape: f32[16,16], index: 2, kind: input, shape index: {}]   ;;  %s3211_s3 = inlined_call_operand.vmem [shape: f32[2,16], index: 3, kind: input, shape index: {}]   ;;  %s3212_s4 = inlined_call_operand.vmem [shape: f32[16,2], index: 4, kind: input, shape index: {}]   ;;  %s3213_s5 = inlined_call_operand.vmem [shape: f32[4,32], index: 5, kind: input, shape index: {}]   ;;  %s3214_s6 = inlined_call_operand.vmem [shape: f32[4,32], index: 6, kind: input, shape index: {}]   ;;  %s3215_s7 = inlined_call_operand.vmem [shape: f32[1,32], index: 7, kind: input, shape index: {}]   ;;  %s3216_s8 = inlined_call_operand.vmem [shape: f32[32,32], index: 8, kind: input, shape index: {}]   ;;  %s3217_s9 = inlined_call_operand.vmem [shape: f32[32,32], index: 9, kind: input, shape index: {}]   ;;  %s3218_s10 = inlined_call_operand.vmem [shape: f32[1,32], index: 10, kind: input, shape index: {}]   ;;  %s3219_s11 = inlined_call_operand.vmem [shape: f32[32,32], index: 11, kind: input, shape index: {}]   ;;  %s3220_s12 = inlined_call_operand.vmem [shape: f32[32,32], index: 12, kind: input, shape index: {}]   ;;  %s3221_s13 = inlined_call_operand.vmem [shape: f32[1,32], index: 13, kind: input, shape index: {}]   ;;  %s3222_s14 = inlined_call_operand.vmem [shape: f32[1,32], index: 14, kind: input, shape index: {}]   ;;  %s3223_s15 = inlined_call_operand.vmem [shape: f32[1,32], index: 15, kind: input, shape index: {}]   ;;  %s3224_s16 = inlined_call_operand.vmem [shape: f32[1,32], index: 16, kind: input, shape index: {}]   ;;  %s3225_s17 = inlined_call_operand.vmem [shape: f32[32,32], index: 17, kind: input, shape index: {}]   ;;  %s3226_s18 = inlined_call_operand.vmem [shape: f32[32,32], index: 18, kind: input, shape index: {}]   ;;  %s3227_s19 = inlined_call_operand.vmem [shape: f32[1,32], index: 19, kind: input, shape index: {}]   ;;  %s3228_s20 = inlined_call_operand.vmem [shape: f32[32,16], index: 20, kind: input, shape index: {}]   ;;  %s3229_s21 = inlined_call_operand.vmem [shape: f32[1,16], index: 21, kind: input, shape index: {}]   ;;  %s3230_s22 = inlined_call_operand.vmem [shape: f32[16,4], index: 22, kind: input, shape index: {}]   ;;  %s3231_s23 = inlined_call_operand.vmem [shape: f32[1,4], index: 23, kind: input, shape index: {}]   ;;  %s3232_s24 = inlined_call_operand.hbm [shape: f32[2,4], index: 24, kind: output, shape index: {}]  }
   0x1   :  { %3238 = sst [smem:[#allocation5_spill]] %s3208_s0 }
   0x2   :  { %3239 = sst [smem:[#allocation6_spill]] %s3209_s1 }
   0x3   :  { %3240 = sst [smem:[#allocation7_spill]] %s3210_s2 }
   0x4   :  { %3241 = sst [smem:[#allocation8_spill]] %s3211_s3 }
   0x5   :  { %3242 = sst [smem:[#allocation9_spill]] %s3212_s4 }
   0x6   :  { %3243 = sst [smem:[#allocation10_spill]] %s3213_s5 }
   0x7   :  { %3244 = sst [smem:[#allocation11_spill]] %s3214_s6 }
   0x8   :  { %3245 = sst [smem:[#allocation12_spill]] %s3215_s7 }
   0x9   :  { %3246 = sst [smem:[#allocation13_spill]] %s3216_s8 }
   0xa   :  { %s3247_s27 = sld [smem:[#allocation6_spill]]  ;;  %s3248_s0 = sld [smem:[#allocation5_spill]]  ;;  %v2509_v3 = vmov 0.0   ;;  %vm2510_vm0 = vmmov 0   ;;  %vm156_vm1 = vcmask 1041408  }
   0xb   :  { %2232 = vmatprep.subr.bf16.mxu0 %v2509_v3  ;;  %2234 = vmatprep.mubr.msk.bf16.mxu0 %vm2510_vm0, %v2509_v3  ;;  %s3249_s8 = sld [smem:[#allocation10_spill]] }
  0x10   :  { %v97_v0 = vld [vmem:[%s3247_s27] sm:$0xff]  ;;  %v98_v1 = vld [vmem:[%s3247_s27 + $0x8] sm:$0xff] }
  0x11   :  { %v79_v2 = vld [vmem:[%s3248_s0] sm:$0xff]  ;;  %v103_v4 = vpack.c.bf16 %v98_v1, %v97_v0  ;;  %v80_v5 = vld [vmem:[%s3248_s0 + $0x8] sm:$0xff] }
  0x12   :  { %v99_v6 = vld [vmem:[%s3249_s8] sm:$0xf] }
  0x13   :  { %29 = vsyncpa [#allocation3], 0  ;;  %v2661_v7 = vpack.c.bf16 %v80_v5, %v79_v2  ;;  %v149_v8 = vpack.c.bf16 %v99_v6, %v99_v6  ;;  %2238 = vmatprep.subr.bf16.mxu1 %v2509_v3  ;;  %2240 = vmatprep.mubr.msk.bf16.mxu1 %vm2510_vm0, %v2509_v3  ;;  %vm104_vm2 = vcmask 130048   ;;  %s3250_s5 = sld [smem:[#allocation11_spill]]  ;;  %vm152_vm3 = vcmask 31744   ;;  %s3251_s28 = sld [smem:[#allocation12_spill]] }
  0x14   :  { %2233 = vmatpush3.bf16.msra.mxu0 %v103_v4  ;;  %v2106_v30 = vld [vmem:[%s3222_s14] ss:$0 sm:$0xff]  ;;  %vm267_vm4 = vcmask 261120   ;;  %v2511_v38 = vmov 1.0   ;;  %v86_v39 = vlaneseq  ;;  %v2512_v50 = vmov 1.0|1.0  }
  0x15   :  { %2244 = vmatprep.subr.bf16.mxu0 %v2509_v3  ;;  %v205_v9 = vsel %vm156_vm1, %v149_v8, 0  ;;  %s3252_s0 = sld [smem:[#allocation7_spill]]  ;;  %v2513_v63 = vmov 0   ;;  %v2514_v0 = vmov 0.0|0.0   ;;  %s3255_s8 = sld [smem:[#allocation8_spill]] }
  0x16   :  { %v2696_v40 = vshrl.u32 %v86_v39, 7  ;;  %v2698_v41 = vand.u32 127, %v86_v39  ;;  %2445 = vset.pattern.permute.xlu0 %v2513_v63  ;;  %2446 = vset.pattern.permute.xlu1 %v2513_v63 }
  0x17   :  { %2235 = vmatmul.mubr.msk.bf16.vlgmr.msra.gmra.mrb[0].mxu0 %vm104_vm2, %v2661_v7 }
  0x18   :  { %2245 = vmatpush3.bf16.msra.mxu0 %v205_v9  ;;  %2246 = vmatprep.mubr.msk.bf16.mxu0 %vm2510_vm0, %v2509_v3  ;;  %v2701_v42 = vadd.s32 8, %v2696_v40  ;;  %vm91_vm5 = vcmp.eq.s32.totalorder %v2696_v40, %v2698_v41  ;;  %vm361_vm10 = vcmp.lt.s32.totalorder %v2698_v41, %v2696_v40 }
  0x19   :  { %v100_v10 = vld [vmem:[%s3250_s5] sm:$0xf]  ;;  %v2708_v44 = vsel %vm91_vm5, 1.0, %v2509_v3  ;;  %2411 = vmatprep.subr.bf16.mxu0 %v2514_v0  ;;  %s3256_s5 = sld [smem:[#allocation13_spill]] }
  0x1a   :  { %v151_v11 = vpack.c.bf16 %v100_v10, %v100_v10  ;;  %v2105_v22 = vld [vmem:[%s3251_s28] ss:$0 sm:$0xff]  ;;  %vm92_vm6 = vcmp.eq.s32.totalorder %v2701_v42, %v2698_v41  ;;  %vm362_vm7 = vcmp.lt.s32.totalorder %v2698_v41, %v2701_v42 }
  0x1b   :  { %v2711_v45 = vsel %vm92_vm6, 1.0, %v2509_v3  ;;  %v2719_v51 = vld [vmem:[%s3252_s0] sm:$0xff]  ;;  %v2729_v52 = vld [vmem:[%s3252_s0 + $0x8] sm:$0xff] }
  0x1c   :  { %v158_v12 = vsel %vm156_vm1, %v151_v11, 0 }
  0x1d   :  { %2239 = vmatpush3.bf16.msra.mxu1 %v158_v12 }
  0x1f   :  { %2247 = vmatmul.mubr.msk.bf16.vlgmr.msra.gmra.mrb[4].mxu0 %vm152_vm3, %v103_v4 }
  0x20   :  { %2268 = vmatprep.mubr.msk.f32.mxu0 %vm2510_vm0, %v2509_v3 }
  0xea   :  { %v142_v13 = vpop.f32.mrb[0].mxu0 }
  0xeb   :  { %v2236_v14 = vpop.f32.mrb[1].mxu0 }
  0xec   :  { %v145_v15 = vpop.f32.mrb[2].mxu0  ;;  %v2774_v14 = vld [vmem:[%s3255_s8] sm:$0x3] }
  0xed   :  { %v150_v16 = vpack.c.bf16 %v145_v15, %v142_v13  ;;  %v2237_v17 = vpop.f32.mrb[3].mxu0 }
  0xef   :  { %2241 = vmatmul.mubr.msk.bf16.vlgmr.msra.gmra.mrb[0].mxu1 %vm152_vm3, %v150_v16 }
  0xf0   :  { %2254 = vmatprep.mubr.msk.f32.mxu1 %vm104_vm2, %v2511_v38 }
  0xf2   :  { %v241_v18 = vpop.f32.mrb[4].mxu0 }
  0xf3   :  { %v2248_v19 = vpop.f32.mrb[5].mxu0 }
  0xf4   :  { %v244_v20 = vpop.f32.mrb[6].mxu0  ;;  %v695_v19 = vld [vmem:[%s3256_s5] sm:$0xff] }
  0xf5   :  { %v2249_v21 = vpop.f32.mrb[7].mxu0 }
 0x1c2   :  { %v194_v23 = vpop.f32.mrb[0].mxu1 }
 0x1c3   :  { %v242_v24 = vadd.f32 %v241_v18, %v194_v23  ;;  %v2242_v25 = vpop.f32.mrb[1].mxu1  ;;  %v700_v23 = vld [vmem:[%s3217_s9 + $0x8] sm:$0xff] }
 0x1c4   :  { %v197_v26 = vpop.f32.mrb[2].mxu1 }
 0x1c5   :  { %v2679_v27 = vadd.f32 %v2105_v22, %v242_v24  ;;  %v245_v28 = vadd.f32 %v244_v20, %v197_v26  ;;  %v2243_v29 = vpop.f32.mrb[3].mxu1  ;;  %v696_v20 = vld [vmem:[%s3256_s5 + $0x8] sm:$0xff]  ;;  %v2804_v24 = vpack.c.bf16 %v2774_v14, %v2774_v14  ;;  %v697_v26 = vld [vmem:[%s3256_s5 + $0x10] sm:$0xff] }
 0x1c6   :  { %v745_v25 = vpack.c.bf16 %v696_v20, %v695_v19 }
 0x1c7   :  { %v256_v31 = vmax.f32 %v2679_v27, 0.0  ;;  %v2685_v32 = vadd.f32 %v2105_v22, %v245_v28  ;;  %v699_v22 = vld [vmem:[%s3217_s9] sm:$0xff]  ;;  %v698_v27 = vld [vmem:[%s3256_s5 + $0x18] sm:$0xff] }
 0x1c8   :  { %v748_v28 = vpack.c.bf16 %v700_v23, %v699_v22  ;;  %v746_v29 = vpack.c.bf16 %v698_v27, %v697_v26 }
 0x1c9   :  { %v257_v33 = vmax.f32 %v2685_v32, 0.0  ;;  %v265_v34 = vmul.f32 %v2106_v30, %v256_v31  ;;  %v701_v32 = vld [vmem:[%s3217_s9 + $0x10] sm:$0xff] }
 0x1cb   :  { %v268_v35 = vsel %vm267_vm4, %v265_v34, 0.0  ;;  %v266_v36 = vmul.f32 %v2106_v30, %v257_v33 }
 0x1cc   :  { %269 = vadd.xlane.f32.xlu0 %v268_v35 }
 0x1cd   :  { %v271_v37 = vsel %vm267_vm4, %v266_v36, 0.0 }
 0x1d0   :  { %272 = vadd.xlane.f32.xlu0 %v271_v37 }
 0x259   :  { %v270_v43 = vpop.xlane.xlu0 %269 }
 0x25a   :  { %v277_v47 = vmul.f32 %v2708_v44, %v270_v43  ;;  %2463 = vtanh.f32 %v270_v43 }
 0x25d   :  { %v273_v46 = vpop.xlane.xlu0 %272 }
 0x25e   :  { %v278_v48 = vmul.f32 %v2711_v45, %v273_v46  ;;  %2465 = vtanh.f32 %v273_v46 }
 0x260   :  { %v2405_v49 = vpack.c.bf16 %v278_v48, %v277_v47 }
 0x262   :  { %2406 = vmatprep.subr.bf16.mxu1 %v2405_v49 }
 0x263   :  { %2408 = vmatpush3.bf16.msra.mxu1 %v2405_v49 }
 0x264   :  { %2409 = vmatprep.subr.bf16.mxu1 %v2512_v50  ;;  %v2464_v5 = vpop.eup %2463 }
 0x266   :  { %2255 = vmatmul.mubr.msk.f32.vlgmr.msra.gmra.mrb[4].mxu1 %vm104_vm2, %v2511_v38 }
 0x267   :  { %2410 = vmatpush3.bf16.msra.mxu1 %v2512_v50  ;;  %2261 = vmatprep.mubr.msk.f32.mxu1 %vm104_vm2, %v2719_v51 }
 0x268   :  { %2271 = vmatprep.subr.bf16.mxu1 %v2509_v3  ;;  %v2466_v10 = vpop.eup %2465 }
 0x26a   :  { %2262 = vmatmul.mubr.msk.f32.vlgmr.msra.gmra.mrb[6].mxu1 %vm104_vm2, %v2729_v52 }
 0x26b   :  { %2273 = vmatprep.mubr.msk.bf16.mxu1 %vm2510_vm0, %v2509_v3 }
 0x339   :  { %v2256_v53 = vpop.f32.mrb[4].mxu1 }
 0x33a   :  { %vm358_vm8 = vcmp.gt.f32.partialorder %v2256_v53, %v273_v46  ;;  %vm360_vm9 = vcmp.eq.f32.partialorder %v2256_v53, %v273_v46  ;;  %v348_v54 = vpop.f32.mrb[5].mxu1 }
 0x33b   :  { %vm364_vm11 = vmand %vm360_vm9, %vm362_vm7  ;;  %vm357_vm12 = vcmp.gt.f32.partialorder %v348_v54, %v270_v43  ;;  %vm359_vm13 = vcmp.eq.f32.partialorder %v348_v54, %v270_v43 }
 0x33c   :  { %vm366_vm14 = vmor %vm358_vm8, %vm364_vm11 }
 0x33d   :  { %vm363_vm15 = vmand %vm359_vm13, %vm361_vm10  ;;  %v2263_v55 = vpop.f32.mrb[6].mxu1  ;;  %v2110_v58 = vsel %vm366_vm14, 1.0, %v2509_v3 }
 0x33e   :  { %vm365_vm1 = vmor %vm357_vm12, %vm363_vm15  ;;  %v451_v56 = vpop.f32.mrb[7].mxu1  ;;  %v372_v61 = vmul.f32 %v2110_v58, %v2729_v52  ;;  %v461_v4 = vmul.f32 0.8, %v2263_v55 }
 0x33f   :  { %v2109_v57 = vsel %vm365_vm1, 1.0, %v2509_v3  ;;  %v460_v1 = vmul.f32 0.8, %v451_v56  ;;  %v2124_v56 = vld [vmem:[%s3218_s10] ss:$0 sm:$0xff]  ;;  %s3257_s10 = sld [smem:[#allocation9_spill]] }
 0x340   :  { %v371_v59 = vmul.f32 %v2109_v57, %v2719_v51  ;;  %v376_v62 = vsel %vm104_vm2, %v372_v61, 0.0 }
 0x342   :  { %v373_v60 = vsel %vm104_vm2, %v371_v59, 0.0 }
 0x343   :  { %374 = vadd.xlane.f32.xlu1 %v373_v60 }
 0x347   :  { %377 = vadd.xlane.f32.xlu1 %v376_v62 }
 0x3d0   :  { %v375_v2 = vpop.xlane.xlu1 %374 }
 0x3d1   :  { %vm462_vm3 = vcmp.lt.f32.partialorder %v375_v2, %v460_v1  ;;  %v2125_v2 = vld [vmem:[%s3223_s15] ss:$0 sm:$0xff] }
 0x3d2   :  { %v2756_v6 = vsel %vm462_vm3, 1.0, %v2509_v3 }
 0x3d3   :  { %v470_v8 = vmul.f32 %v2464_v5, %v2756_v6  ;;  %vm863_vm8 = vcmp.gt.f32.partialorder %v2756_v6, 0.5 }
 0x3d4   :  { %v378_v9 = vpop.xlane.xlu1 %377 }
 0x3d5   :  { %vm463_vm5 = vcmp.lt.f32.partialorder %v378_v9, %v461_v4  ;;  %474 = vperm.xlu0 %2445, %v470_v8  }
 0x3d6   :  { %v2760_v11 = vsel %vm463_vm5, 1.0, %v2509_v3  ;;  %vm2762_vm6 = vmpackc.low %vm463_vm5, %vm462_vm3 }
 0x3d7   :  { %2413 = vmatpush3.bf16.msk.msra.mxu0 %vm2762_vm6, %v2512_v50  ;;  %v471_v13 = vmul.f32 %v2466_v10, %v2760_v11  ;;  %vm864_vm9 = vcmp.gt.f32.partialorder %v2760_v11, 0.5 }
 0x3d8   :  { %2277 = vmatprep.subr.bf16.mxu0 %v2509_v3 }
 0x3d9   :  { %479 = vperm.xlu1 %2446, %v471_v13  }
 0x3da   :  { %2269 = vmatmul.mubr.msk.f32.vlgmr.msra.gmra.mrb[8].mxu0 %vm104_vm2, %v2774_v14 }
 0x3db   :  { %2279 = vmatprep.mubr.msk.bf16.mxu0 %vm2510_vm0, %v2509_v3 }
 0x454   :  { %v475_v15 = vpop.permute.xlu0 %474 }
 0x455   :  { %v2782_v17 = vmul.f32 %v475_v15, %v256_v31 }
 0x458   :  { %v480_v16 = vpop.permute.xlu1 %479 }
 0x459   :  { %v2786_v18 = vmul.f32 %v480_v16, %v257_v33  ;;  %v702_v33 = vld [vmem:[%s3217_s9 + $0x18] sm:$0xff] }
 0x45a   :  { %v749_v34 = vpack.c.bf16 %v702_v33, %v701_v32 }
 0x45b   :  { %v558_v21 = vpack.c.bf16 %v2786_v18, %v2782_v17 }
 0x45d   :  { %2272 = vmatpush3.bf16.msra.mxu1 %v558_v21  ;;  %2278 = vmatpush3.bf16.msra.mxu0 %v558_v21 }
 0x45e   :  { %2291 = vmatprep.subr.bf16.mxu0 %v2509_v3  ;;  %2283 = vmatprep.subr.bf16.mxu1 %v2509_v3 }
 0x460   :  { %2280 = vmatmul.mubr.msk.bf16.vlgmr.msra.gmra.mrb[12].mxu0 %vm104_vm2, %v2661_v7  ;;  %2274 = vmatmul.mubr.msk.bf16.vlgmr.msra.gmra.mrb[8].mxu1 %vm104_vm2, %v2804_v24 }
 0x461   :  { %2292 = vmatpush3.bf16.msra.mxu0 %v745_v25  ;;  %2295 = vmatprep.mubr.msk.bf16.mxu0 %vm2510_vm0, %v2509_v3 }
 0x462   :  { %2293 = vmatprep.subr.bf16.mxu0 %v2509_v3  ;;  %2284 = vmatpush3.bf16.msra.mxu1 %v748_v28 }
 0x463   :  { %2285 = vmatprep.subr.bf16.mxu1 %v2509_v3  ;;  %2287 = vmatprep.mubr.msk.bf16.mxu1 %vm2510_vm0, %v2509_v3 }
 0x465   :  { %2294 = vmatpush3.bf16.msra.mxu0 %v746_v29 }
 0x466   :  { %2419 = vmatprep.subr.msk.bf16.mxu0 %vm2762_vm6, %v2512_v50  ;;  %2286 = vmatpush3.bf16.msra.mxu1 %v749_v34 }
 0x468   :  { %2296 = vmatmul.mubr.msk.bf16.vlgmr.msra.gmra.mrb[16].mxu0 %vm267_vm4, %v558_v21 }
 0x469   :  { %2421 = vmatpush3.bf16.msk.msra.mxu0 %vm2762_vm6, %v2512_v50  ;;  %2310 = vmatprep.mubr.msk.f32.mxu0 %vm104_vm2, %v2719_v51 }
 0x46a   :  { %2320 = vmatprep.subr.bf16.mxu0 %v2509_v3 }
 0x470   :  { %2311 = vmatmul.mubr.msk.f32.vlgmr.msra.gmra.mrb[10].mxu0 %vm104_vm2, %v2729_v52 }
 0x471   :  { %2322 = vmatprep.mubr.msk.bf16.mxu0 %vm2510_vm0, %v2509_v3 }
 0x4ad   :  { %v2838_v30 = vpop.f32.mrb[8].mxu0 }
 0x4ae   :  { %v2270_v31 = vpop.f32.mrb[9].mxu0 }
 0x533   :  { %v738_v35 = vpop.f32.mrb[12].mxu0  ;;  %v2846_v36 = vpop.f32.mrb[8].mxu1 }
 0x534   :  { %v2281_v37 = vpop.f32.mrb[13].mxu0  ;;  %v2275_v39 = vpop.f32.mrb[9].mxu1 }
 0x535   :  { %v741_v43 = vpop.f32.mrb[14].mxu0  ;;  %v599_v46 = vpop.f32.mrb[10].mxu1 }
 0x536   :  { %v747_v47 = vpack.c.bf16 %v741_v43, %v738_v35  ;;  %v2282_v48 = vpop.f32.mrb[15].mxu0  ;;  %v2276_v49 = vpop.f32.mrb[11].mxu1 }
 0x538   :  { %2288 = vmatmul.mubr.msk.bf16.vlgmr.msra.gmra.mrb[12].mxu1 %vm267_vm4, %v747_v47 }
 0x539   :  { %2303 = vmatprep.mubr.msk.f32.mxu1 %vm104_vm2, %v2511_v38 }
 0x53b   :  { %v831_v50 = vpop.f32.mrb[16].mxu0 }
 0x53c   :  { %v2297_v53 = vpop.f32.mrb[17].mxu0 }
 0x53d   :  { %v834_v54 = vpop.f32.mrb[18].mxu0 }
 0x53e   :  { %v2298_v55 = vpop.f32.mrb[19].mxu0 }
 0x543   :  { %v2312_v27 = vpop.f32.mrb[10].mxu0 }
 0x544   :  { %v1040_v28 = vpop.f32.mrb[11].mxu0  ;;  %v1050_v43 = vmul.f32 0.8, %v2312_v27 }
 0x545   :  { %v1049_v46 = vmul.f32 0.8, %v1040_v28 }
 0x60b   :  { %v787_v57 = vpop.f32.mrb[12].mxu1 }
 0x60c   :  { %v832_v58 = vadd.f32 %v831_v50, %v787_v57  ;;  %v2289_v59 = vpop.f32.mrb[13].mxu1 }
 0x60d   :  { %v790_v60 = vpop.f32.mrb[14].mxu1 }
 0x60e   :  { %v2854_v61 = vadd.f32 %v2124_v56, %v832_v58  ;;  %v835_v62 = vadd.f32 %v834_v54, %v790_v60  ;;  %v2290_v1 = vpop.f32.mrb[15].mxu1 }
 0x610   :  { %v846_v4 = vmax.f32 %v2854_v61, 0.0  ;;  %v2860_v5 = vadd.f32 %v2124_v56, %v835_v62  ;;  %v1277_v61 = vld [vmem:[%s3220_s12] sm:$0xff] }
 0x612   :  { %v847_v8 = vmax.f32 %v2860_v5, 0.0  ;;  %v855_v9 = vmul.f32 %v2125_v2, %v846_v4 }
 0x614   :  { %v857_v10 = vsel %vm267_vm4, %v855_v9, 0.0  ;;  %v856_v12 = vmul.f32 %v2125_v2, %v847_v8  ;;  %v1273_v9 = vld [vmem:[%s3219_s11] sm:$0xff] }
 0x615   :  { %858 = vadd.xlane.f32.xlu1 %v857_v10  ;;  %v1274_v10 = vld [vmem:[%s3219_s11 + $0x8] sm:$0xff] }
 0x616   :  { %v860_v13 = vsel %vm267_vm4, %v856_v12, 0.0  ;;  %v1323_v5 = vpack.c.bf16 %v1274_v10, %v1273_v9 }
 0x617   :  { %861 = vadd.xlane.f32.xlu0 %v860_v13  ;;  %v1276_v13 = vld [vmem:[%s3219_s11 + $0x18] sm:$0xff] }
 0x6a2   :  { %v859_v15 = vpop.xlane.xlu1 %858 }
 0x6a3   :  { %v865_v16 = vsel %vm863_vm8, %v859_v15, -1e+30  ;;  %2467 = vtanh.f32 %v859_v15 }
 0x6a4   :  { %869 = vperm.xlu1 %2446, %v865_v16   ;;  %v862_v19 = vpop.xlane.xlu0 %861 }
 0x6a5   :  { %v866_v20 = vsel %vm864_vm9, %v862_v19, -1e+30  ;;  %2469 = vtanh.f32 %v862_v19 }
 0x6a8   :  { %874 = vperm.xlu1 %2446, %v866_v20   ;;  %v1279_v20 = vld [vmem:[%s3220_s12 + $0x10] sm:$0xff] }
 0x6ad   :  { %v2468_v55 = vpop.eup %2467 }
 0x6af   :  { %v2470_v58 = vpop.eup %2469 }
 0x723   :  { %v870_v21 = vpop.permute.xlu1 %869 }
 0x724   :  { %v877_v23 = vmul.f32 %v2708_v44, %v870_v21 }
 0x727   :  { %v875_v22 = vpop.permute.xlu1 %874 }
 0x728   :  { %v878_v25 = vmul.f32 %v2711_v45, %v875_v22 }
 0x72a   :  { %v2414_v26 = vpack.c.bf16 %v878_v25, %v877_v23 }
 0x72c   :  { %2415 = vmatprep.subr.bf16.mxu1 %v2414_v26 }
 0x72d   :  { %2417 = vmatpush3.bf16.msra.mxu1 %v2414_v26 }
 0x72e   :  { %2422 = vmatprep.subr.bf16.mxu1 %v2514_v0 }
 0x730   :  { %2304 = vmatmul.mubr.msk.f32.vlgmr.msra.gmra.mrb[16].mxu1 %vm104_vm2, %v2511_v38 }
 0x731   :  { %2317 = vmatprep.mubr.msk.f32.mxu1 %vm2510_vm0, %v2509_v3 }
 0x803   :  { %v2305_v29 = vpop.f32.mrb[16].mxu1 }
 0x804   :  { %vm955_vm11 = vcmp.gt.f32.partialorder %v2305_v29, %v875_v22  ;;  %vm957_vm12 = vcmp.eq.f32.partialorder %v2305_v29, %v875_v22  ;;  %v945_v31 = vpop.f32.mrb[17].mxu1 }
 0x805   :  { %vm959_vm13 = vmand %vm957_vm12, %vm362_vm7  ;;  %vm954_vm14 = vcmp.gt.f32.partialorder %v945_v31, %v870_v21  ;;  %vm956_vm15 = vcmp.eq.f32.partialorder %v945_v31, %v870_v21  ;;  %v1280_v21 = vld [vmem:[%s3220_s12 + $0x18] sm:$0xff] }
 0x806   :  { %vm961_vm1 = vmor %vm955_vm11, %vm959_vm13  ;;  %v1327_v22 = vpack.c.bf16 %v1280_v21, %v1279_v20 }
 0x807   :  { %vm958_vm3 = vmand %vm956_vm15, %vm361_vm10  ;;  %v2129_v32 = vsel %vm961_vm1, 1.0, %v2509_v3 }
 0x808   :  { %vm960_vm5 = vmor %vm954_vm14, %vm958_vm3  ;;  %v967_v33 = vmul.f32 %v2129_v32, %v2729_v52 }
 0x809   :  { %v2128_v34 = vsel %vm960_vm5, 1.0, %v2509_v3 }
 0x80a   :  { %v971_v35 = vsel %vm104_vm2, %v967_v33, 0.0  ;;  %v966_v37 = vmul.f32 %v2128_v34, %v2719_v51 }
 0x80b   :  { %972 = vadd.xlane.f32.xlu0 %v971_v35 }
 0x80c   :  { %v968_v39 = vsel %vm104_vm2, %v966_v37, 0.0 }
 0x80d   :  { %969 = vadd.xlane.f32.xlu1 %v968_v39 }
 0x898   :  { %v973_v47 = vpop.xlane.xlu0 %972 }
 0x899   :  { %vm1052_vm6 = vcmp.lt.f32.partialorder %v973_v47, %v1050_v43  ;;  %v2141_v43 = vld [vmem:[%s3221_s13] ss:$0 sm:$0xff]  ;;  %s2515_s13 = smov 1  }
 0x89a   :  { %v2135_v48 = vsel %vm1052_vm6, 1.0, %v2509_v3  ;;  %v970_v49 = vpop.xlane.xlu1 %969 }
 0x89b   :  { %v2892_v50 = vmul.f32 %v2135_v48, %v2760_v11  ;;  %vm1051_vm8 = vcmp.lt.f32.partialorder %v970_v49, %v1049_v46 }
 0x89c   :  { %v2134_v53 = vsel %vm1051_vm8, 1.0, %v2509_v3 }
 0x89d   :  { %v2896_v54 = vmul.f32 %v2134_v53, %v2756_v6  ;;  %v1062_v59 = vmul.f32 %v2470_v58, %v2892_v50  ;;  %vm1442_vm11 = vcmp.gt.f32.partialorder %v2892_v50, 0.5 }
 0x89f   :  { %v2423_v56 = vpack.c.bf16 %v2892_v50, %v2896_v54  ;;  %v1061_v57 = vmul.f32 %v2468_v55, %v2896_v54  ;;  %vm1441_vm9 = vcmp.gt.f32.partialorder %v2896_v54, 0.5 }
 0x8a1   :  { %2424 = vmatpush3.bf16.msra.mxu1 %v2423_v56  ;;  %1065 = vperm.xlu0 %2445, %v1061_v57   ;;  %v2142_v57 = vld [vmem:[%s3224_s16] ss:$0 sm:$0xff] }
 0x8a2   :  { %2326 = vmatprep.subr.bf16.mxu1 %v2509_v3 }
 0x8a4   :  { %2318 = vmatmul.mubr.msk.f32.vlgmr.msra.gmra.mrb[18].mxu1 %vm104_vm2, %v2774_v14 }
 0x8a5   :  { %1070 = vperm.xlu0 %2445, %v1062_v59   ;;  %2328 = vmatprep.mubr.msk.bf16.mxu1 %vm2510_vm0, %v2509_v3 }
 0x920   :  { %v1066_v60 = vpop.permute.xlu0 %1065 }
 0x921   :  { %v2909_v1 = vmul.f32 %v1066_v60, %v846_v4  ;;  %v1278_v4 = vld [vmem:[%s3220_s12 + $0x8] sm:$0xff] }
 0x922   :  { %v1326_v15 = vpack.c.bf16 %v1278_v4, %v1277_v61 }
 0x924   :  { %v1071_v62 = vpop.permute.xlu0 %1070 }
 0x925   :  { %v2913_v2 = vmul.f32 %v1071_v62, %v847_v8  ;;  %v1275_v8 = vld [vmem:[%s3219_s11 + $0x10] sm:$0xff] }
 0x926   :  { %v1324_v16 = vpack.c.bf16 %v1276_v13, %v1275_v8 }
 0x927   :  { %v1145_v12 = vpack.c.bf16 %v2913_v2, %v2909_v1 }
 0x929   :  { %2321 = vmatpush3.bf16.msra.mxu0 %v1145_v12  ;;  %2327 = vmatpush3.bf16.msra.mxu1 %v1145_v12 }
 0x92a   :  { %2340 = vmatprep.subr.bf16.mxu1 %v2509_v3  ;;  %2332 = vmatprep.subr.bf16.mxu0 %v2509_v3 }
 0x92c   :  { %2329 = vmatmul.mubr.msk.bf16.vlgmr.msra.gmra.mrb[20].mxu1 %vm104_vm2, %v2661_v7  ;;  %2323 = vmatmul.mubr.msk.bf16.vlgmr.msra.gmra.mrb[20].mxu0 %vm104_vm2, %v2804_v24 }
 0x92d   :  { %2341 = vmatpush3.bf16.msra.mxu1 %v1323_v5  ;;  %2344 = vmatprep.mubr.msk.bf16.mxu1 %vm2510_vm0, %v2509_v3 }
 0x92e   :  { %2342 = vmatprep.subr.bf16.mxu1 %v2509_v3  ;;  %2333 = vmatpush3.bf16.msra.mxu0 %v1326_v15 }
 0x92f   :  { %2334 = vmatprep.subr.bf16.mxu0 %v2509_v3  ;;  %2336 = vmatprep.mubr.msk.bf16.mxu0 %vm2510_vm0, %v2509_v3 }
 0x931   :  { %2343 = vmatpush3.bf16.msra.mxu1 %v1324_v16 }
 0x932   :  { %2430 = vmatprep.subr.bf16.mxu1 %v2423_v56  ;;  %2335 = vmatpush3.bf16.msra.mxu0 %v1327_v22 }
 0x934   :  { %2345 = vmatmul.mubr.msk.bf16.vlgmr.msra.gmra.mrb[24].mxu1 %vm267_vm4, %v1145_v12 }
 0x935   :  { %2432 = vmatpush3.bf16.msra.mxu1 %v2423_v56  ;;  %2359 = vmatprep.mubr.msk.f32.mxu1 %vm104_vm2, %v2719_v51 }
 0x936   :  { %2369 = vmatprep.subr.bf16.mxu1 %v2509_v3 }
 0x93c   :  { %2360 = vmatmul.mubr.msk.f32.vlgmr.msra.gmra.mrb[28].mxu1 %vm104_vm2, %v2729_v52 }
 0x93d   :  { %2371 = vmatprep.mubr.msk.bf16.mxu1 %vm2510_vm0, %v2509_v3 }
 0x977   :  { %v2955_v7 = vpop.f32.mrb[18].mxu1 }
 0x978   :  { %v2319_v19 = vpop.f32.mrb[19].mxu1 }
 0x9ff   :  { %v1316_v23 = vpop.f32.mrb[20].mxu1  ;;  %v2963_v25 = vpop.f32.mrb[20].mxu0 }
 0xa00   :  { %v2330_v26 = vpop.f32.mrb[21].mxu1  ;;  %v2324_v27 = vpop.f32.mrb[21].mxu0 }
 0xa01   :  { %v1319_v28 = vpop.f32.mrb[22].mxu1  ;;  %v1183_v29 = vpop.f32.mrb[22].mxu0 }
 0xa02   :  { %v1325_v31 = vpack.c.bf16 %v1319_v28, %v1316_v23  ;;  %v2331_v32 = vpop.f32.mrb[23].mxu1  ;;  %v2325_v33 = vpop.f32.mrb[23].mxu0 }
 0xa04   :  { %2337 = vmatmul.mubr.msk.bf16.vlgmr.msra.gmra.mrb[24].mxu0 %vm267_vm4, %v1325_v31 }
 0xa05   :  { %2352 = vmatprep.mubr.msk.f32.mxu0 %vm104_vm2, %v2511_v38 }
 0xa07   :  { %v1409_v34 = vpop.f32.mrb[24].mxu1 }
 0xa08   :  { %v2346_v35 = vpop.f32.mrb[25].mxu1 }
 0xa09   :  { %v1412_v37 = vpop.f32.mrb[26].mxu1 }
 0xa0a   :  { %v2347_v39 = vpop.f32.mrb[27].mxu1 }
 0xa0f   :  { %v2361_v21 = vpop.f32.mrb[28].mxu1 }
 0xa10   :  { %v1618_v22 = vpop.f32.mrb[29].mxu1  ;;  %v1628_v41 = vmul.f32 0.8, %v2361_v21 }
 0xa11   :  { %v1627_v28 = vmul.f32 0.8, %v1618_v22 }
 0xad7   :  { %v1365_v46 = vpop.f32.mrb[24].mxu0 }
 0xad8   :  { %v1410_v47 = vadd.f32 %v1409_v34, %v1365_v46  ;;  %v2338_v48 = vpop.f32.mrb[25].mxu0  ;;  %v2447_v46 = vpack.i.bf16 %v2760_v11, %v2756_v6 }
 0xad9   :  { %v1368_v49 = vpop.f32.mrb[26].mxu0 }
 0xada   :  { %v2971_v53 = vadd.f32 %v2141_v43, %v1410_v47  ;;  %v1413_v55 = vadd.f32 %v1412_v37, %v1368_v49  ;;  %v2339_v56 = vpop.f32.mrb[27].mxu0  ;;  %v2516_v47 = vmov 1  }
 0xadc   :  { %v1424_v58 = vmax.f32 %v2971_v53, 0.0  ;;  %v2977_v59 = vadd.f32 %v2141_v43, %v1413_v55  ;;  %v84_v53 = vld [vmem:[%s3257_s10] sm:$0xff] }
 0xade   :  { %v1425_v60 = vmax.f32 %v2977_v59, 0.0  ;;  %v1433_v62 = vmul.f32 %v2142_v57, %v1424_v58 }
 0xae0   :  { %v1435_v9 = vsel %vm267_vm4, %v1433_v62, 0.0  ;;  %v1434_v10 = vmul.f32 %v2142_v57, %v1425_v60 }
 0xae1   :  { %1436 = vadd.xlane.f32.xlu0 %v1435_v9 }
 0xae2   :  { %v1438_v12 = vsel %vm267_vm4, %v1434_v10, 0.0  ;;  %v85_v10 = vld [vmem:[%s3257_s10 + $0x8] sm:$0xff] }
 0xae3   :  { %1439 = vadd.xlane.f32.xlu1 %v1438_v12  ;;  %v1195_v12 = vmul.f32 %v2896_v54, %v84_v53 }
 0xb6e   :  { %v1437_v61 = vpop.xlane.xlu0 %1436 }
 0xb6f   :  { %v1443_v4 = vsel %vm1441_vm9, %v1437_v61, -1e+30  ;;  %2471 = vtanh.f32 %v1437_v61 }
 0xb70   :  { %1447 = vperm.xlu1 %2446, %v1443_v4   ;;  %v1440_v5 = vpop.xlane.xlu1 %1439 }
 0xb71   :  { %v1444_v8 = vsel %vm1442_vm11, %v1440_v5, -1e+30  ;;  %2473 = vtanh.f32 %v1440_v5 }
 0xb74   :  { %1452 = vperm.xlu1 %2446, %v1444_v8   ;;  %v611_v8 = vmul.f32 %v2756_v6, %v84_v53 }
 0xb78   :  { %2452 = vset.pattern.permute.xlu1 %v2516_v47 }
 0xb79   :  { %v2472_v34 = vpop.eup %2471 }
 0xb7b   :  { %v2474_v39 = vpop.eup %2473 }
 0xbef   :  { %v1448_v13 = vpop.permute.xlu1 %1447 }
 0xbf0   :  { %v1455_v16 = vmul.f32 %v2708_v44, %v1448_v13 }
 0xbf3   :  { %v1453_v15 = vpop.permute.xlu1 %1452 }
 0xbf4   :  { %v1456_v19 = vmul.f32 %v2711_v45, %v1453_v15 }
 0xbf6   :  { %v2425_v20 = vpack.c.bf16 %v1456_v19, %v1455_v16  ;;  %v612_v19 = vmul.f32 %v2760_v11, %v85_v10 }
 0xbf8   :  { %2426 = vmatprep.subr.bf16.mxu0 %v2425_v20 }
 0xbf9   :  { %2428 = vmatpush3.bf16.msra.mxu0 %v2425_v20 }
 0xbfa   :  { %2433 = vmatprep.subr.bf16.mxu0 %v2514_v0 }
 0xbfc   :  { %2353 = vmatmul.mubr.msk.f32.vlgmr.msra.gmra.mrb[28].mxu0 %vm104_vm2, %v2511_v38 }
 0xbfd   :  { %2366 = vmatprep.mubr.msk.f32.mxu0 %vm2510_vm0, %v2509_v3 }
 0xccf   :  { %v2354_v23 = vpop.f32.mrb[28].mxu0 }
 0xcd0   :  { %vm1533_vm12 = vcmp.gt.f32.partialorder %v2354_v23, %v1453_v15  ;;  %vm1535_vm13 = vcmp.eq.f32.partialorder %v2354_v23, %v1453_v15  ;;  %v1523_v26 = vpop.f32.mrb[29].mxu0 }
 0xcd1   :  { %vm1537_vm14 = vmand %vm1535_vm13, %vm362_vm7  ;;  %vm1532_vm15 = vcmp.gt.f32.partialorder %v1523_v26, %v1448_v13  ;;  %vm1534_vm1 = vcmp.eq.f32.partialorder %v1523_v26, %v1448_v13  ;;  %vm613_vm13 = vcmp.gt.f32.partialorder %v611_v8, 0.5 }
 0xcd2   :  { %vm1539_vm3 = vmor %vm1533_vm12, %vm1537_vm14  ;;  %vm1197_vm12 = vcmp.gt.f32.partialorder %v1195_v12, 0.5  ;;  %v615_v6 = vsel %vm613_vm13, 1, %v2513_v63 }
 0xcd3   :  { %vm1536_vm5 = vmand %vm1534_vm1, %vm361_vm10  ;;  %v2146_v38 = vsel %vm1539_vm3, 1.0, %v2509_v3  ;;  %v1199_v15 = vsel %vm1197_vm12, 1, %v2513_v63 }
 0xcd4   :  { %vm1538_vm6 = vmor %vm1532_vm15, %vm1536_vm5  ;;  %v1545_v44 = vmul.f32 %v2146_v38, %v2729_v52  ;;  %vm614_vm15 = vcmp.gt.f32.partialorder %v612_v19, 0.5 }
 0xcd5   :  { %v2145_v45 = vsel %vm1538_vm6, 1.0, %v2509_v3  ;;  %v616_v23 = vsel %vm614_vm15, 1, %v2513_v63 }
 0xcd6   :  { %v1549_v0 = vsel %vm104_vm2, %v1545_v44, 0.0  ;;  %v1544_v27 = vmul.f32 %v2145_v45, %v2719_v51  ;;  %v602_v45 = vmax.f32 %v2838_v30, 1.0 }
 0xcd7   :  { %1550 = vadd.xlane.f32.xlu0 %v1549_v0 }
 0xcd8   :  { %v1546_v42 = vsel %vm104_vm2, %v1544_v27, 0.0 }
 0xcd9   :  { %1547 = vadd.xlane.f32.xlu1 %v1546_v42 }
 0xcea   :  { %1237 = vrot.lane.b32.xlu1 %v2892_v50, %s2515_s13 }
 0xd64   :  { %v1551_v29 = vpop.xlane.xlu0 %1550 }
 0xd65   :  { %vm1630_vm7 = vcmp.lt.f32.partialorder %v1551_v29, %v1628_v41  ;;  %v1186_v29 = vmax.f32 %v2955_v7, 1.0 }
 0xd66   :  { %v2150_v52 = vsel %vm1630_vm7, 1.0, %v2509_v3  ;;  %v1548_v31 = vpop.xlane.xlu1 %1547  ;;  %vm636_vm7 = vcmp.gt.f32.partialorder %v2838_v30, 0.5 }
 0xd67   :  { %v3011_v32 = vmul.f32 %v2150_v52, %v2892_v50  ;;  %vm1629_vm10 = vcmp.lt.f32.partialorder %v1548_v31, %v1627_v28  ;;  %v637_v41 = vsel %vm636_vm7, 1, %v2513_v63 }
 0xd68   :  { %v2149_v51 = vsel %vm1629_vm10, 1.0, %v2509_v3 }
 0xd69   :  { %v3015_v33 = vmul.f32 %v2149_v51, %v2896_v54  ;;  %v1640_v43 = vmul.f32 %v2474_v39, %v3011_v32  ;;  %v1774_v38 = vmul.f32 %v3011_v32, %v85_v10  ;;  %v1860_v39 = vld [vmem:[%s3226_s18 + $0x10] sm:$0xff] }
 0xd6a   :  { %v1238_v13 = vpop.permute.xlu1 %1237 }
 0xd6b   :  { %v2434_v35 = vpack.c.bf16 %v3011_v32, %v3015_v33  ;;  %v1639_v37 = vmul.f32 %v2472_v34, %v3015_v33  ;;  %v1242_v20 = vmul.f32 %v1238_v13, %v85_v10  ;;  %v1773_v21 = vmul.f32 %v3015_v33, %v84_v53  ;;  %v1859_v34 = vld [vmem:[%s3226_s18 + $0x8] sm:$0xff] }
 0xd6c   :  { %vm1776_vm6 = vcmp.gt.f32.partialorder %v1774_v38, 0.5 }
 0xd6d   :  { %2435 = vmatpush3.bf16.msra.mxu0 %v2434_v35  ;;  %1643 = vperm.xlu0 %2445, %v1639_v37   ;;  %vm1244_vm1 = vcmp.gt.f32.partialorder %v1242_v20, 0.5  ;;  %vm1775_vm3 = vcmp.gt.f32.partialorder %v1773_v21, 0.5  ;;  %v1778_v42 = vsel %vm1776_vm6, 1, %v2513_v63 }
 0xd6e   :  { %2375 = vmatprep.subr.bf16.mxu0 %v2509_v3  ;;  %v1246_v11 = vsel %vm1244_vm1, 1, %v2513_v63  ;;  %v1777_v44 = vsel %vm1775_vm3, 1, %v2513_v63 }
 0xd70   :  { %2367 = vmatmul.mubr.msk.f32.vlgmr.msra.gmra.mrb[30].mxu0 %vm104_vm2, %v2774_v14 }
 0xd71   :  { %1648 = vperm.xlu0 %2445, %v1640_v43   ;;  %2379 = vmatprep.mubr.msk.bf16.mxu0 %vm2510_vm0, %v2509_v3  ;;  %v1861_v43 = vld [vmem:[%s3226_s18 + $0x18] sm:$0xff] }
 0xd75   :  { %2448 = vrot.lane.b32.xlu0 %v2447_v46, %s2515_s13  ;;  %v1864_v46 = vpack.c.bf16 %v1861_v43, %v1860_v39 }
 0xd76   :  { %2453 = vset.pattern.permute.xlu0 %v2516_v47 }
 0xd79   :  { %1235 = vrot.lane.b32.xlu0 %v2896_v54, %s2515_s13 }
 0xd7d   :  { %1813 = vrot.lane.b32.xlu0 %v3015_v33, %s2515_s13  ;;  %v1858_v33 = vld [vmem:[%s3226_s18] sm:$0xff] }
 0xd7e   :  { %v1863_v35 = vpack.c.bf16 %v1859_v34, %v1858_v33 }
 0xd80   :  { %2376 = vmatpush3.bf16.msra.mxu0 %v1863_v35 }
 0xd81   :  { %1815 = vrot.lane.b32.xlu0 %v3011_v32, %s2515_s13  ;;  %2377 = vmatprep.subr.bf16.mxu0 %v2509_v3 }
 0xd84   :  { %2378 = vmatpush3.bf16.msra.mxu0 %v1864_v46 }
 0xd85   :  { %2391 = vmatprep.subr.bf16.mxu0 %v2509_v3 }
 0xdec   :  { %v1644_v14 = vpop.permute.xlu0 %1643 }
 0xded   :  { %v3039_v49 = vmul.f32 %v1644_v14, %v1424_v58  ;;  %v1854_v14 = vld [vmem:[%s3225_s17 + $0x18] sm:$0xff] }
 0xdf0   :  { %v1649_v48 = vpop.permute.xlu0 %1648 }
 0xdf1   :  { %v3043_v55 = vmul.f32 %v1649_v48, %v1425_v60 }
 0xdf3   :  { %v1723_v56 = vpack.c.bf16 %v3043_v55, %v3039_v49 }
 0xdf4   :  { %v2449_v57 = vpop.permute.xlu0 %2448 }
 0xdf5   :  { %v2451_v62 = vunpack.i.h.bf16 %v2449_v57  ;;  %v2450_v9 = vunpack.i.l.bf16 %v2449_v57  ;;  %2370 = vmatpush3.bf16.msra.mxu1 %v1723_v56 }
 0xdf6   :  { %2383 = vmatprep.subr.bf16.mxu1 %v2509_v3 }
 0xdf7   :  { %v661_v58 = vmul.f32 %v2451_v62, %v85_v10  ;;  %v660_v59 = vmul.f32 %v2450_v9, %v84_v53 }
 0xdf8   :  { %v1236_v60 = vpop.permute.xlu0 %1235  ;;  %2372 = vmatmul.mubr.msk.bf16.vlgmr.msra.gmra.mrb[32].mxu1 %vm104_vm2, %v2804_v24  ;;  %v1196_v24 = vmul.f32 %v2892_v50, %v85_v10 }
 0xdf9   :  { %v1241_v61 = vmul.f32 %v1236_v60, %v84_v53  ;;  %vm663_vm8 = vcmp.gt.f32.partialorder %v661_v58, 0.5  ;;  %vm662_vm9 = vcmp.gt.f32.partialorder %v660_v59, 0.5  ;;  %2387 = vmatprep.mubr.msk.bf16.mxu1 %vm2510_vm0, %v2509_v3 }
 0xdfa   :  { %v665_v4 = vsel %vm663_vm8, 1, %v2513_v63  ;;  %v664_v5 = vsel %vm662_vm9, 1, %v2513_v63  ;;  %vm1198_vm14 = vcmp.gt.f32.partialorder %v1196_v24, 0.5  ;;  %vm1220_vm9 = vcmp.gt.f32.partialorder %v2955_v7, 0.5  ;;  %v1851_v7 = vld [vmem:[%s3225_s17] sm:$0xff] }
 0xdfb   :  { %vm1243_vm11 = vcmp.gt.f32.partialorder %v1241_v61, 0.5  ;;  %670 = vperm.xlu0 %2453, %v665_v4   ;;  %667 = vperm.xlu1 %2452, %v664_v5   ;;  %v1200_v50 = vsel %vm1198_vm14, 1, %v2513_v63  ;;  %v1221_v51 = vsel %vm1220_vm9, 1, %v2513_v63 }
 0xdfc   :  { %v1245_v54 = vsel %vm1243_vm11, 1, %v2513_v63  ;;  %v1814_v16 = vpop.permute.xlu0 %1813 }
 0xdfd   :  { %v1819_v0 = vmul.f32 %v1814_v16, %v84_v53 }
 0xdff   :  { %1248 = vperm.xlu0 %2453, %v1245_v54   ;;  %2454 = vset.pattern.permute.xlu1 %v2513_v63  ;;  %vm1821_vm10 = vcmp.gt.f32.partialorder %v1819_v0, 0.5 }
 0xe00   :  { %1202 = vperm.xlu1 %2454, %v1199_v15   ;;  %v1816_v22 = vpop.permute.xlu0 %1815  ;;  %v1823_v28 = vsel %vm1821_vm10, 1, %v2513_v63 }
 0xe01   :  { %v1820_v26 = vmul.f32 %v1816_v22, %v85_v10 }
 0xe03   :  { %2455 = vset.pattern.permute.xlu0 %v2513_v63  ;;  %vm1822_vm5 = vcmp.gt.f32.partialorder %v1820_v26, 0.5 }
 0xe04   :  { %618 = vperm.xlu0 %2455, %v615_v6   ;;  %1205 = vperm.xlu1 %2454, %v1200_v50   ;;  %v1824_v27 = vsel %vm1822_vm5, 1, %v2513_v63 }
 0xe08   :  { %621 = vperm.xlu0 %2455, %v616_v23   ;;  %2456 = vset.pattern.permute.xlu1 %v2516_v47 }
 0xe09   :  { %1251 = vperm.xlu1 %2456, %v1246_v11  }
 0xe0c   :  { %1780 = vperm.xlu0 %2455, %v1777_v44  }
 0xe0d   :  { %2457 = vset.pattern.permute.xlu1 %v2513_v63 }
 0xe0e   :  { %605 = vperm.xlu1 %2457, %v602_v45  }
 0xe10   :  { %2458 = vset.pattern.permute.xlu0 %v2516_v47 }
 0xe11   :  { %1829 = vperm.xlu0 %2458, %v1824_v27  }
 0xe12   :  { %1783 = vperm.xlu1 %2457, %v1778_v42  }
 0xe15   :  { %2461 = vset.pattern.permute.xlu0 %v2513_v63 }
 0xe16   :  { %639 = vperm.xlu0 %2461, %v637_v41   ;;  %2459 = vset.pattern.permute.xlu1 %v2516_v47 }
 0xe17   :  { %1826 = vperm.xlu1 %2459, %v1823_v28  }
 0xe1b   :  { %2460 = vset.pattern.permute.xlu1 %v2513_v63 }
 0xe1c   :  { %1189 = vperm.xlu1 %2460, %v1186_v29  }
 0xe43   :  { %v1719_v52 = vpop.f32.mrb[30].mxu0 }
 0xe44   :  { %v1764_v31 = vmax.f32 %v1719_v52, 1.0  ;;  %vm1798_vm8 = vcmp.gt.f32.partialorder %v1719_v52, 0.5  ;;  %v2368_v30 = vpop.f32.mrb[31].mxu0 }
 0xe45   :  { %v1799_v32 = vsel %vm1798_vm8, 1, %v2513_v63  ;;  %v1852_v63 = vld [vmem:[%s3225_s17 + $0x8] sm:$0xff] }
 0xe46   :  { %1801 = vperm.xlu0 %2461, %v1799_v32   ;;  %1767 = vperm.xlu1 %2460, %v1764_v31   ;;  %v1856_v37 = vpack.c.bf16 %v1852_v63, %v1851_v7 }
 0xe48   :  { %2384 = vmatpush3.bf16.msra.mxu1 %v1856_v37 }
 0xe49   :  { %2385 = vmatprep.subr.bf16.mxu1 %v2509_v3 }
 0xe4a   :  { %1223 = vperm.xlu1 %2460, %v1221_v51   ;;  %2462 = vset.pattern.permute.xlu0 %v2516_v47  ;;  %v1853_v47 = vld [vmem:[%s3225_s17 + $0x10] sm:$0xff] }
 0xe4b   :  { %v1857_v48 = vpack.c.bf16 %v1854_v14, %v1853_v47 }
 0xe4d   :  { %2386 = vmatpush3.bf16.msra.mxu1 %v1857_v48 }
 0xe4e   :  { %2399 = vmatprep.subr.bf16.mxu1 %v2509_v3 }
 0xe7a   :  { %v668_v56 = vpop.permute.xlu1 %667  ;;  %v671_v10 = vpop.permute.xlu0 %670 }
 0xe7b   :  { %vm673_vm13 = vcmp.eq.s32.totalorder %v671_v10, 1  ;;  %vm672_vm14 = vcmp.eq.s32.totalorder %v668_v56, 1 }
 0xe7c   :  { %v675_v15 = vsel %vm673_vm13, %v2786_v18, -1e+30  ;;  %v674_v16 = vsel %vm672_vm14, %v2782_v17, -1e+30 }
 0xe7d   :  { %v677_v22 = vsel %vm267_vm4, %v675_v15, -inf  ;;  %v676_v23 = vsel %vm267_vm4, %v674_v16, -inf  ;;  %v691_v16 = vsub.s32 1, %v2696_v40 }
 0xe7e   :  { %v1249_v58 = vpop.permute.xlu0 %1248  ;;  %v678_v26 = vmax.f32 %v676_v23, %v677_v22 }
 0xe7f   :  { %v1203_v57 = vpop.permute.xlu1 %1202  ;;  %vm1253_vm5 = vcmp.eq.s32.totalorder %v1249_v58, 1 }
 0xe80   :  { %vm1207_vm6 = vcmp.eq.s32.totalorder %v1203_v57, 1  ;;  %v1255_v44 = vsel %vm1253_vm5, %v2909_v1, -1e+30  ;;  %v679_v29 = vrot.slane %v678_v26, 4 }
 0xe81   :  { %v1209_v45 = vsel %vm1207_vm6, %v2909_v1, -1e+30  ;;  %v1257_v31 = vsel %vm267_vm4, %v1255_v44, -inf }
 0xe82   :  { %v1211_v30 = vsel %vm267_vm4, %v1209_v45, -inf  ;;  %v680_v35 = vmax.f32 %v678_v26, %v679_v29 }
 0xe83   :  { %v1206_v62 = vpop.permute.xlu1 %1205  ;;  %v619_v60 = vpop.permute.xlu0 %618 }
 0xe84   :  { %vm623_vm12 = vcmp.eq.s32.totalorder %v619_v60, 1  ;;  %vm1208_vm15 = vcmp.eq.s32.totalorder %v1206_v62, 1  ;;  %v681_v46 = vrot.slane %v680_v35, 2 }
 0xe85   :  { %v625_v8 = vsel %vm623_vm12, %v2782_v17, -1e+30  ;;  %v1210_v17 = vsel %vm1208_vm15, %v2913_v2, -1e+30  ;;  %vm686_vm12 = vcmp.eq.s32.totalorder %v2696_v40, 1 }
 0xe86   :  { %v627_v20 = vsel %vm267_vm4, %v625_v8, -inf  ;;  %v1212_v42 = vsel %vm267_vm4, %v1210_v17, -inf  ;;  %v682_v62 = vmax.f32 %v680_v35, %v681_v46 }
 0xe87   :  { %v622_v61 = vpop.permute.xlu0 %621  ;;  %v1213_v51 = vmax.f32 %v1211_v30, %v1212_v42 }
 0xe88   :  { %v1252_v9 = vpop.permute.xlu1 %1251  ;;  %vm624_vm11 = vcmp.eq.s32.totalorder %v622_v61, 1 }
 0xe89   :  { %v626_v5 = vsel %vm624_vm11, %v2786_v18, -1e+30  ;;  %vm1254_vm1 = vcmp.eq.s32.totalorder %v1252_v9, 1  ;;  %v1214_v37 = vrot.slane %v1213_v51, 4  ;;  %vm643_vm11 = vcmp.eq.s32.totalorder %v2696_v40, 0 }
 0xe8a   :  { %v628_v54 = vsel %vm267_vm4, %v626_v5, -inf }
 0xe8b   :  { %v1781_v24 = vpop.permute.xlu0 %1780  ;;  %v629_v6 = vmax.f32 %v627_v20, %v628_v54  ;;  %v1215_v14 = vmax.f32 %v1213_v51, %v1214_v37 }
 0xe8c   :  { %vm1785_vm7 = vcmp.eq.s32.totalorder %v1781_v24, 1  ;;  %v648_v24 = vsub.s32 0, %v2696_v40 }
 0xe8d   :  { %v606_v53 = vpop.permute.xlu1 %605  ;;  %v630_v38 = vrot.slane %v629_v6, 4  ;;  %v1787_v0 = vsel %vm1785_vm7, %v3039_v49, -1e+30 }
 0xe8e   :  { %2475 = vrcp.f32 %v606_v53  ;;  %v1789_v1 = vsel %vm267_vm4, %v1787_v0, -inf  ;;  %v1216_v53 = vrot.slane %v1215_v14, 2 }
 0xe8f   :  { %v631_v52 = vmax.f32 %v629_v6, %v630_v38  ;;  %v2120_v38 = vsel %vm686_vm12, 1.0, %v2509_v3 }
 0xe90   :  { %v1830_v11 = vpop.permute.xlu0 %1829  ;;  %v1217_v5 = vmax.f32 %v1215_v14, %v1216_v53 }
 0xe91   :  { %v1784_v59 = vpop.permute.xlu1 %1783  ;;  %vm1832_vm8 = vcmp.eq.s32.totalorder %v1830_v11, 1  ;;  %v632_v7 = vrot.slane %v631_v52, 2  ;;  %v2119_v11 = vsel %vm643_vm11, 1.0, %v2509_v3 }
 0xe92   :  { %vm1786_vm3 = vcmp.eq.s32.totalorder %v1784_v59, 1 }
 0xe95   :  { %v640_v60 = vpop.permute.xlu0 %639 }
 0xe96   :  { %v1827_v12 = vpop.permute.xlu1 %1826  ;;  %vm641_vm9 = vcmp.eq.s32.totalorder %v640_v60, 1 }
 0xe97   :  { %vm1831_vm10 = vcmp.eq.s32.totalorder %v1827_v12, 1  ;;  %v683_v12 = vrot.slane %v682_v62, 1 }
 0xe98   :  { %v2476_v13 = vpop.eup %2475  ;;  %v1833_v27 = vsel %vm1831_vm10, %v3039_v49, -1e+30 }
 0xe99   :  { %v609_v50 = vmul.f32 %v2476_v13, %v2846_v36  ;;  %v1256_v36 = vsel %vm1254_vm1, %v2913_v2, -1e+30  ;;  %v1834_v2 = vsel %vm1832_vm8, %v3043_v55, -1e+30  ;;  %v1835_v32 = vsel %vm267_vm4, %v1833_v27, -inf }
 0xe9a   :  { %v1258_v41 = vsel %vm267_vm4, %v1256_v36, -inf  ;;  %v1836_v34 = vsel %vm267_vm4, %v1834_v2, -inf  ;;  %v684_v54 = vmax.f32 %v682_v62, %v683_v12 }
 0xe9b   :  { %v1190_v4 = vpop.permute.xlu1 %1189  ;;  %v1259_v49 = vmax.f32 %v1257_v31, %v1258_v41  ;;  %v1837_v63 = vmax.f32 %v1835_v32, %v1836_v34 }
 0xe9c   :  { %2477 = vrcp.f32 %v1190_v4 }
 0xe9d   :  { %v1260_v39 = vrot.slane %v1259_v49, 4  ;;  %v1838_v47 = vrot.slane %v1837_v63, 4 }
 0xe9f   :  { %v1261_v48 = vmax.f32 %v1259_v49, %v1260_v39  ;;  %v1839_v9 = vmax.f32 %v1837_v63, %v1838_v47 }
 0xea1   :  { %v1262_v58 = vrot.slane %v1261_v48, 2  ;;  %v1840_v61 = vrot.slane %v1839_v9, 2 }
 0xea3   :  { %v1263_v8 = vmax.f32 %v1261_v48, %v1262_v58  ;;  %v1841_v15 = vmax.f32 %v1839_v9, %v1840_v61  ;;  %v1962_v9 = vld [vmem:[%s3228_s20 + $0x10] sm:$0xff] }
 0xea5   :  { %v1264_v22 = vrot.slane %v1263_v8, 1  ;;  %v1842_v17 = vrot.slane %v1841_v15, 1 }
 0xea6   :  { %v2478_v19 = vpop.eup %2477 }
 0xea7   :  { %v1193_v21 = vmul.f32 %v2478_v19, %v2963_v25  ;;  %v1788_v25 = vsel %vm1786_vm3, %v3043_v55, -1e+30  ;;  %v633_v55 = vmax.f32 %v631_v52, %v632_v7  ;;  %v685_v19 = vsel %vm641_vm9, %v684_v54, 0.0 }
 0xea8   :  { %v1790_v28 = vsel %vm267_vm4, %v1788_v25, -inf  ;;  %v692_v26 = vrot.slane %v685_v19, %v691_v16  ;;  %v1265_v44 = vmax.f32 %v1263_v8, %v1264_v22  ;;  %v1843_v42 = vmax.f32 %v1841_v15, %v1842_v17  ;;  %v2019_v19 = vld [vmem:[%s3230_s22 + $0x8] sm:$0xff] }
 0xea9   :  { %v3130_v18 = vadd.f32 %v1193_v21, %v609_v50  ;;  %v1791_v33 = vmax.f32 %v1789_v1, %v1790_v28  ;;  %v634_v57 = vrot.slane %v633_v55, 1  ;;  %v1218_v21 = vrot.slane %v1217_v5, 1 }
 0xeaa   :  { %v693_v29 = vmul.f32 %v2120_v38, %v692_v26 }
 0xeab   :  { %v1792_v43 = vrot.slane %v1791_v33, 4  ;;  %v635_v59 = vmax.f32 %v633_v55, %v634_v57  ;;  %v1219_v25 = vmax.f32 %v1217_v5, %v1218_v21  ;;  %v1960_v57 = vld [vmem:[%s3228_s20] sm:$0xff] }
 0xead   :  { %v1793_v56 = vmax.f32 %v1791_v33, %v1792_v43  ;;  %v642_v13 = vsel %vm641_vm9, %v635_v59, 0.0 }
 0xeae   :  { %v649_v23 = vrot.slane %v642_v13, %v648_v24 }
 0xeaf   :  { %v1794_v10 = vrot.slane %v1793_v56, 2 }
 0xeb0   :  { %v650_v0 = vmul.f32 %v2119_v11, %v649_v23 }
 0xeb1   :  { %v1795_v4 = vmax.f32 %v1793_v56, %v1794_v10  ;;  %v1963_v10 = vld [vmem:[%s3228_s20 + $0x18] sm:$0xff] }
 0xeb2   :  { %v694_v32 = vadd.f32 %v693_v29, %v650_v0  ;;  %v1966_v53 = vpack.c.bf16 %v1963_v10, %v1962_v9 }
 0xeb3   :  { %v1796_v6 = vrot.slane %v1795_v4, 1 }
 0xeb5   :  { %v1797_v36 = vmax.f32 %v1795_v4, %v1796_v6  ;;  %v2155_v4 = vld [vmem:[%s3227_s19] ss:$0 sm:$0xff] }
 0xeb6   :  { %v2156_v6 = vld [vmem:[%s3229_s21] ss:$0 sm:$0xff]  ;;  %s2517_s21 = smov [#allocation2]  }
 0xec5   :  { %v1802_v20 = vpop.permute.xlu0 %1801  ;;  %v1768_v50 = vpop.permute.xlu1 %1767 }
 0xec6   :  { %2479 = vrcp.f32 %v1768_v50  ;;  %vm1803_vm13 = vcmp.eq.s32.totalorder %v1802_v20, 1 }
 0xec7   :  { %v1804_v27 = vsel %vm1803_vm13, %v1797_v36, 0.0  ;;  %v1844_v30 = vsel %vm1803_vm13, %v1843_v42, 0.0 }
 0xec8   :  { %v1808_v51 = vrot.slane %v1804_v27, %v648_v24  ;;  %v1848_v35 = vrot.slane %v1844_v30, %v691_v16 }
 0xec9   :  { %v1224_v45 = vpop.permute.xlu1 %1223 }
 0xeca   :  { %vm1225_vm14 = vcmp.eq.s32.totalorder %v1224_v45, 1  ;;  %v1809_v39 = vmul.f32 %v2119_v11, %v1808_v51  ;;  %v1849_v46 = vmul.f32 %v2120_v38, %v1848_v35 }
 0xecb   :  { %v1226_v41 = vsel %vm1225_vm14, %v1219_v25, 0.0  ;;  %v1266_v40 = vsel %vm1225_vm14, %v1265_v44, 0.0  ;;  %v1758_v28 = vpop.f32.mrb[32].mxu1 }
 0xecc   :  { %v1230_v52 = vrot.slane %v1226_v41, %v648_v24  ;;  %v1270_v2 = vrot.slane %v1266_v40, %v691_v16  ;;  %v2373_v31 = vpop.f32.mrb[33].mxu1  ;;  %v2018_v16 = vld [vmem:[%s3230_s22] sm:$0xff]  ;;  %s2092_s22 = sshll.u32 %s2517_s21, 4  ;;  %s2093_s22 = int_to_ptr.vmem [resolvable:$true] %s2092_s22 }
 0xecd   :  { %v1761_v1 = vpop.f32.mrb[34].mxu1  ;;  %v2021_v20 = vpack.c.bf16 %v2019_v19, %v2018_v16  ;;  %p2490_p1 = scmp.lt.s32.totalorder %s2093_s22, %s2093_s22 }
 0xece   :  { %v1231_v49 = vmul.f32 %v2119_v11, %v1230_v52  ;;  %v2374_v33 = vpop.f32.mrb[35].mxu1  ;;  %v1271_v63 = vmul.f32 %v2120_v38, %v1270_v2  ;;  %v2158_v38 = vld [vmem:[%s3231_s23] ss:$0 sm:$0xff]  ;;  %s2485_s23 = scalar_lea.vmem %s2093_s22, 32 }
 0xecf   :  { %p2486_p0 = scmp.ne.s32.totalorder %s2093_s22, %s2485_s23  ;;  %p2491_p2 = scmp.lt.s32.totalorder %s2485_s23, %s2485_s23 }
 0xed0   :  { %v2480_v34 = vpop.eup %2479  ;;  %v1232_v7 = vadd.f32 %v1231_v49, %v694_v32 }
 0xed1   :  { %v1771_v37 = vmul.f32 %v2480_v34, %v1758_v28  ;;  %p2492_p3 = por %p2491_p2, %p2490_p1 }
 0xed2   :  { %v1272_v43 = vadd.f32 %v1271_v63, %v1232_v7 }
 0xed3   :  { %v1772_v55 = vadd.f32 %v1771_v37, %v3130_v18  ;;  %v1961_v18 = vld [vmem:[%s3228_s20 + $0x8] sm:$0xff]  ;;  %p2493_p4 = pnand %p2492_p3, %p2486_p0 }
 0xed4   :  { %v1810_v47 = vadd.f32 %v1809_v39, %v1272_v43  ;;  %v1965_v62 = vpack.c.bf16 %v1961_v18, %v1960_v57 }
 0xed5   :  { %v1862_v14 = vpack.c.bf16 %v1772_v55, %v1772_v55 }
 0xed6   :  { %v1850_v48 = vadd.f32 %v1849_v46, %v1810_v47 }
 0xed7   :  { %2380 = vmatmul.mubr.msk.bf16.vlgmr.msra.gmra.mrb[32].mxu0 %vm267_vm4, %v1862_v14 }
 0xed8   :  { %v1855_v56 = vpack.c.bf16 %v1850_v48, %v1850_v48  ;;  %2395 = vmatprep.mubr.msk.bf16.mxu0 %vm2510_vm0, %v2509_v3  ;;  %2392 = vmatpush3.bf16.msra.mxu0 %v1965_v62 }
 0xed9   :  { %2393 = vmatprep.subr.bf16.mxu0 %v2509_v3 }
 0xeda   :  { %2388 = vmatmul.mubr.msk.bf16.vlgmr.msra.gmra.mrb[36].mxu1 %vm267_vm4, %v1855_v56 }
 0xedb   :  { %2401 = vmatprep.mubr.msk.bf16.mxu1 %vm2510_vm0, %v2509_v3  ;;  %2400 = vmatpush3.bf16.msra.mxu1 %v2021_v20  ;;  %vm2072_vm0 = vcmask 25600  }
 0xedc   :  { %2394 = vmatpush3.bf16.msra.mxu0 %v1966_v53 }
 0xfaa   :  { %v1902_v58 = vpop.f32.mrb[32].mxu0 }
 0xfab   :  { %v2381_v59 = vpop.f32.mrb[33].mxu0 }
 0xfac   :  { %v1905_v60 = vpop.f32.mrb[34].mxu0 }
 0xfad   :  { %v2382_v12 = vpop.f32.mrb[35].mxu0  ;;  %v1945_v61 = vpop.f32.mrb[36].mxu1 }
 0xfae   :  { %v1946_v3 = vadd.f32 %v1945_v61, %v1902_v58  ;;  %v2389_v5 = vpop.f32.mrb[37].mxu1 }
 0xfaf   :  { %v1948_v8 = vpop.f32.mrb[38].mxu1 }
 0xfb0   :  { %v1958_v24 = vadd.f32 %v2155_v4, %v1946_v3  ;;  %v2390_v13 = vpop.f32.mrb[39].mxu1 }
 0xfb2   :  { %v1959_v54 = vmax.f32 %v1958_v24, 0.0 }
 0xfb4   :  { %v1964_v15 = vpack.c.bf16 %v1959_v54, %v1959_v54 }
 0xfb6   :  { %2396 = vmatmul.mubr.msk.bf16.vlgmr.msra.gmra.mrb[36].mxu0 %vm267_vm4, %v1964_v15 }
0x1089   :  { %v2011_v50 = vpop.f32.mrb[36].mxu0 }
0x108a   :  { %v2012_v21 = vadd.f32 %v2156_v6, %v2011_v50  ;;  %v2397_v22 = vpop.f32.mrb[37].mxu0 }
0x108b   :  { %v2014_v23 = vpop.f32.mrb[38].mxu0 }
0x108c   :  { %v2017_v11 = vmax.f32 %v2012_v21, 0.0  ;;  %v2398_v17 = vpop.f32.mrb[39].mxu0 }
0x108e   :  { %v2020_v26 = vpack.c.bf16 %v2017_v11, %v2017_v11 }
0x1090   :  { %2402 = vmatmul.mubr.msk.bf16.vlgmr.msra.gmra.mrb[40].mxu1 %vm104_vm2, %v2020_v26 }
0x1163   :  { %v2066_v36 = vpop.f32.mrb[40].mxu1 }
0x1164   :  { %v2067_v25 = vadd.f32 %v2158_v38, %v2066_v36  ;;  %v2403_v44 = vpop.f32.mrb[41].mxu1 }
0x1165   :  { %v2069_v45 = vpop.f32.mrb[42].mxu1 }
0x1166   :  { %v2404_v0 = vpop.f32.mrb[43].mxu1  ;;  %v2073_v27 = vsel %vm2072_vm0, %v2067_v25, -inf }
0x1167   :  { %2074 = vmax.xlane.f32.xlu1 %v2073_v27 }
0x11f4   :  { %v2075_v42 = vpop.xlane.xlu1 %2074 }
0x11f5   :  { %v2076_v41 = vsub.f32 %v2067_v25, %v2075_v42 }
0x11f7   :  { %v2077_v40 = vmul.f32 1.442695, %v2076_v41 }
0x11f9   :  { %2481 = vpow2.f32 %v2077_v40 }
0x1203   :  { %v2482_v28 = vpop.eup %2481 }
0x1204   :  { %v2079_v29 = vsel %vm2072_vm0, %v2482_v28, 0.0 }
0x1205   :  { %2080 = vadd.xlane.f32.xlu0 %v2079_v29 }
0x1292   :  { %v2081_v52 = vpop.xlane.xlu0 %2080 }
0x1293   :  { %2483 = vlog2.f32 %v2081_v52 }
0x129d   :  { %v2484_v2 = vpop.eup %2483 }
0x129e   :  { %v2083_v31 = vmul.f32 0.6931472, %v2484_v2 }
0x12a0   :  { %v2084_v30 = vsub.f32 %v2076_v41, %v2083_v31 }
0x12a2   :  { %2085 = vst.msk [vmem:[#allocation2] sm:$0x3] %vm2072_vm0, %v2084_v30 }
0x12a3   :  { %2496 = shalt.err (!%p2493_p4)
}
0x12a4   :  { %s2497_s11 = scalar_lea.hbm %s3232_s24, 32 }
0x12a5   :  { %p2498_p5 = scmp.ne.s32.totalorder %s3232_s24, %s2497_s11  ;;  %p2501_p6 = scmp.lt.u32.totalorder %s2497_s11, %s3232_s24 }
0x12a7   :  { %p2503_p7 = pnand %p2501_p6, %p2498_p5 }
0x12a9   :  { %2506 = shalt.err (!%p2503_p7)
}
0x12aa   :  { %2095 = dma.vmem_to_hbm [thread:$0]  %s2093_s22, 32, %s3232_s24, [#allocation3]  }
0x12ab   :  { %2507 = dma.done.wait [#allocation3], 32  }
0x12ac   :  { %2508 = vsyncadd [#allocation3], 4294967264 }
0x12ad   :  { %2099 = vsyncpa [#allocation3], 1 }

</bundles_post_ra>
